<compile_context>
chip_gen: v6e
topology: v6e:2x2x1
jax: 0.10.0
libtpu: 0.0.40
codegen_flags: <defaults>
</compile_context>

<pallas_src>
import functools

import numpy as np

import jax
import jax.numpy as jnp
from jax.experimental import pallas as pl
from jax.experimental.pallas import tpu as pltpu


_VMEM_SPEC = pl.BlockSpec(memory_space=pltpu.MemorySpace.VMEM)


# ----------------------------------------------------------------------------
# Host-side weight packing (one-time, outside the kernel / jit)
# ----------------------------------------------------------------------------
def _banded_conv_weight(w_torch, W):
    """Pack a torch-layout (Cout, Cin, 3, 3) conv weight into a column-banded
    matmul weight of shape (W*Cin, 3*W*Cout).

    Row index : w_in*Cin + c
    Col index : ky*(W*Cout) + w_out*Cout + o
    Entry     : w_torch[o, c, ky, kx] with kx = w_in - w_out + 1 in {0,1,2};
                zero elsewhere.  The zero blocks where w_out + kx - 1 falls
                outside [0, W) implement the joint(W)-direction 'same'
                padding; the camera(H)-direction padding is applied in-kernel
                by zero-padded row shifts of the ky=0 / ky=2 column bands.
    """
    w = np.asarray(w_torch, dtype=np.float32)
    Cout, Cin = int(w.shape[0]), int(w.shape[1])
    wco = W * Cout
    bw = np.zeros((W * Cin, 3 * wco), np.float32)
    for ky in range(3):
        for kx in range(3):
            tap = w[:, :, ky, kx].T          # (Cin, Cout)
            for wo in range(W):
                wi = wo + kx - 1
                if 0 <= wi < W:
                    r = wi * Cin
                    c = ky * wco + wo * Cout
                    bw[r:r + Cin, c:c + Cout] = tap
    return jnp.asarray(bw)


def _wide_bias(b, W):
    """(Cout,) -> (1, W*Cout) so column w*Cout + o carries b[o]."""
    b = np.asarray(b, dtype=np.float32)
    return jnp.asarray(np.tile(b, W).reshape(1, -1))


def _fc_weight_rows(w_fc_torch, C, H, W):
    """Fold torch's NCHW Flatten ordering into the Linear weight.

    (O, C*H*W) -> (H, W*C, O) with out[h, w*C + c, o] = w_fc[o, c*H*W + h*W + w]
    so the kernel can consume activations laid out as rows=(h, n),
    lanes=(w, c) without any runtime transpose.
    """
    wf = np.asarray(w_fc_torch, dtype=np.float32)
    O = int(wf.shape[0])
    w4 = wf.reshape(O, C, H, W)
    return jnp.asarray(np.transpose(w4, (2, 3, 1, 0)).reshape(H, W * C, O))


def init_cnn_params(key, output_size, extra_layers, num_cameras, num_joints_2d):
    """Deterministic torch-style (fan-in uniform) parameters in torch layouts."""
    params = {"convs": []}
    channels = [2, 16] + list(extra_layers)
    for i in range(len(channels) - 1):
        cin, cout = channels[i], channels[i + 1]
        key, kw, kb = jax.random.split(key, 3)
        bound = 1.0 / np.sqrt(cin * 9.0)
        w = jax.random.uniform(kw, (cout, cin, 3, 3), jnp.float32, -bound, bound)
        b = jax.random.uniform(kb, (cout,), jnp.float32, -bound, bound)
        params["convs"].append((w, b))
    flat = channels[-1] * num_cameras * num_joints_2d
    key, kw, kb = jax.random.split(key, 3)
    bound = 1.0 / np.sqrt(float(flat))
    w_fc = jax.random.uniform(kw, (output_size, flat), jnp.float32, -bound, bound)
    b_fc = jax.random.uniform(kb, (output_size,), jnp.float32, -bound, bound)
    params["fc"] = (w_fc, b_fc)
    return params


def pack_params_for_kernel(params, num_cameras, num_joints_2d):
    """Torch-layout params -> kernel-layout params (column-banded conv weights,
    wide biases, flatten-order-folded FC weight).  One-time host-side cost."""
    H, W = num_cameras, num_joints_2d
    conv = [(_banded_conv_weight(w, W), _wide_bias(b, W))
            for w, b in params["convs"]]
    w_fc, b_fc = params["fc"]
    c_last = int(params["convs"][-1][0].shape[0])
    wfc_rows = _fc_weight_rows(w_fc, c_last, H, W)
    bfc_row = jnp.asarray(np.asarray(b_fc, np.float32).reshape(1, -1))
    return {"conv": conv, "fc": (wfc_rows, bfc_row)}


# ----------------------------------------------------------------------------
# Fused Pallas kernel:  [conv3x3 + bias + ReLU] * n_conv  ->  Linear
# ----------------------------------------------------------------------------
def _make_fused_kernel(N, H, W, channels, out_size):
    n_conv = len(channels) - 1
    rows = H * N

    def kernel(*refs):
        x_ref = refs[0]
        conv_refs = refs[1:1 + 2 * n_conv]
        wfc_ref = refs[1 + 2 * n_conv]
        bfc_ref = refs[2 + 2 * n_conv]
        o_ref = refs[3 + 2 * n_conv]

        # Activations stay register/VMEM-resident as lane-dense 2-D slabs:
        #   a[h*N + n, w*C + c] == activation[n, c, h, w]
        a = x_ref[...]                                   # (H*N, W*Cin0)

        for li in range(n_conv):
            cout = channels[li + 1]
            wco = W * cout
            bw_ref = conv_refs[2 * li]                   # (W*Cin, 3*W*Cout)
            b_ref = conv_refs[2 * li + 1]                # (1, W*Cout)

            # One MXU matmul computes, for every input row h, all three ky-tap
            # partial sums (the kx / joint(W) padding already lives in the
            # banded weight's zero blocks).
            m = jnp.dot(a, bw_ref[...], preferred_element_type=jnp.float32)
            m0 = m[:, 0:wco]           # ky = 0 tap, evaluated at input row h
            m1 = m[:, wco:2 * wco]     # ky = 1 tap
            m2 = m[:, 2 * wco:]        # ky = 2 tap

            # Camera(H)-direction 'same' padding: out[h] needs m0 at h-1 and
            # m2 at h+1.  Row shifts commute with the lanes-only matmul, so
            # shift the band OUTPUTS, zero-filling the halo rows.
            z = jnp.zeros((N, wco), jnp.float32)
            dn = jnp.concatenate([z, m0[:rows - N, :]], axis=0)   # h-1 (top halo)
            up = jnp.concatenate([m2[N:, :], z], axis=0)          # h+1 (bottom halo)

            # Bias + ReLU on the VPU.  Dropout == identity at inference.
            a = jnp.maximum(m1 + dn + up + b_ref[...], 0.0)

        # FC: torch's NCHW Flatten ordering is already folded into wfc_ref,
        # so just contract each camera row-block and sum (H tiny, static loop).
        acc = jnp.zeros((N, out_size), jnp.float32) + bfc_ref[...]
        for h in range(H):
            acc = acc + jnp.dot(a[h * N:(h + 1) * N, :], wfc_ref[h],
                                preferred_element_type=jnp.float32)
        o_ref[...] = acc.astype(o_ref.dtype)

    return kernel


@functools.partial(
    jax.jit, static_argnames=("channels", "num_cameras", "num_joints_2d"))
def cnn_model_forward(kparams, x_nchw, *, channels, num_cameras, num_joints_2d):
    """Forward pass. x_nchw: (N, 2, num_cameras, num_joints_2d) float32."""
    N = x_nchw.shape[0]
    H, W = num_cameras, num_joints_2d
    n_conv = len(channels) - 1
    wfc_rows, bfc_row = kparams["fc"]
    out_size = bfc_row.shape[-1]

    # Single tiny input relayout feeding the fused kernel:
    #   a0[h*N + n, w*Cin + c] = x[n, c, h, w]
    a0 = jnp.transpose(x_nchw, (2, 0, 3, 1)).reshape(H * N, W * channels[0])

    conv_args = []
    for bw, bwide in kparams["conv"]:
        conv_args += [bw, bwide]

    kernel = _make_fused_kernel(N, H, W, channels, out_size)
    n_inputs = 1 + 2 * n_conv + 2
    return pl.pallas_call(
        kernel,
        out_shape=jax.ShapeDtypeStruct((N, out_size), x_nchw.dtype),
        in_specs=[_VMEM_SPEC] * n_inputs,
        out_specs=_VMEM_SPEC,
    )(a0, *conv_args, wfc_rows, bfc_row)


# ----------------------------------------------------------------------------
# Pure-JAX reference (mirrors the PyTorch module) used for a correctness check
# ----------------------------------------------------------------------------
def _reference_forward(params, x):
    a = x
    for w, b in params["convs"]:
        a = jax.lax.conv_general_dilated(
            a, w, window_strides=(1, 1), padding="SAME",
            dimension_numbers=("NCHW", "OIHW", "NCHW"),
            precision=jax.lax.Precision.HIGHEST)
        a = jnp.maximum(a + b.reshape(1, -1, 1, 1), 0.0)
    a = a.reshape(a.shape[0], -1)                 # == torch.nn.Flatten on NCHW
    w_fc, b_fc = params["fc"]
    return jnp.dot(a, w_fc.T, precision=jax.lax.Precision.HIGHEST) + b_fc


# ----------------------------------------------------------------------------
if __name__ == "__main__":
    batch = 2
    num_cameras = 4          # H
    num_joints_2d = 16       # W
    extra_layers = [32]
    output_size = 24
    dropout = 0.1            # identity at inference

    channels = tuple([2, 16] + list(extra_layers))

    key = jax.random.PRNGKey(0)
    k_params, k_x = jax.random.split(key)
    params = init_cnn_params(
        k_params, output_size, extra_layers, num_cameras, num_joints_2d)
    kparams = pack_params_for_kernel(params, num_cameras, num_joints_2d)

    x = jax.random.normal(
        k_x, (batch, 2, num_cameras, num_joints_2d), jnp.float32)

    out = cnn_model_forward(
        kparams, x, channels=channels,
        num_cameras=num_cameras, num_joints_2d=num_joints_2d)
    out = jax.block_until_ready(out)

    assert out.shape == (batch, output_size), out.shape
    assert out.dtype == jnp.float32

    # Validate the banded-weight / folded-flatten packing against a plain-JAX
    # reference of the original module.
    ref = _reference_forward(params, x)
    assert jnp.allclose(out, ref, rtol=2e-2, atol=2e-2), (
        float(jnp.max(jnp.abs(out - ref))))

    print("KERNEL_OK")
</pallas_src>

<mosaic_0001>
module attributes {stable_mosaic.version = 11 : i64} {
  func.func @kernel(%arg0: memref<8x32xf32, #tpu.memory_space<vmem>>, %arg1: memref<32x768xf32, #tpu.memory_space<vmem>>, %arg2: memref<1x256xf32, #tpu.memory_space<vmem>>, %arg3: memref<256x1536xf32, #tpu.memory_space<vmem>>, %arg4: memref<1x512xf32, #tpu.memory_space<vmem>>, %arg5: memref<4x512x24xf32, #tpu.memory_space<vmem>>, %arg6: memref<1x24xf32, #tpu.memory_space<vmem>>, %arg7: memref<2x24xf32, #tpu.memory_space<vmem>>) attributes {dimension_semantics = [], scalar_prefetch = 0 : i64, scratch_operands = 0 : i64, tpu.core_type = #tpu.core_type<tc>} {
    %c0 = arith.constant 0 : index
    %c0_0 = arith.constant 0 : index
    %0 = vector.load %arg0[%c0, %c0_0] : memref<8x32xf32, #tpu.memory_space<vmem>>, vector<8x32xf32>
    %c0_1 = arith.constant 0 : index
    %c0_2 = arith.constant 0 : index
    %1 = vector.load %arg1[%c0_1, %c0_2] : memref<32x768xf32, #tpu.memory_space<vmem>>, vector<32x768xf32>
    %cst = arith.constant dense<0.000000e+00> : vector<8x768xf32>
    %2 = tpu.matmul %0, %1, %cst {dimension_numbers = #tpu.dot_dimension_numbers<[1], [0], [0], [1], [0, 0, 1, 1], [], []>} : vector<8x32xf32>, vector<32x768xf32>, vector<8x768xf32> -> vector<8x768xf32>
    %3 = vector.extract_strided_slice %2 {offsets = [0, 0], sizes = [8, 256], strides = [1, 1]} : vector<8x768xf32> to vector<8x256xf32>
    %4 = vector.extract_strided_slice %2 {offsets = [0, 256], sizes = [8, 256], strides = [1, 1]} : vector<8x768xf32> to vector<8x256xf32>
    %5 = vector.extract_strided_slice %2 {offsets = [0, 512], sizes = [8, 256], strides = [1, 1]} : vector<8x768xf32> to vector<8x256xf32>
    %cst_3 = arith.constant 0.000000e+00 : f32
    %6 = vector.broadcast %cst_3 : f32 to vector<2x256xf32>
    %7 = vector.extract_strided_slice %3 {offsets = [0, 0], sizes = [6, 256], strides = [1, 1]} : vector<8x256xf32> to vector<6x256xf32>
    %8 = tpu.concatenate %6, %7 in 0 : vector<2x256xf32>, vector<6x256xf32> -> vector<8x256xf32>
    %9 = vector.extract_strided_slice %5 {offsets = [2, 0], sizes = [6, 256], strides = [1, 1]} : vector<8x256xf32> to vector<6x256xf32>
    %10 = tpu.concatenate %9, %6 in 0 : vector<6x256xf32>, vector<2x256xf32> -> vector<8x256xf32>
    %11 = arith.addf %4, %8 : vector<8x256xf32>
    %12 = arith.addf %11, %10 : vector<8x256xf32>
    %c0_4 = arith.constant 0 : index
    %c0_5 = arith.constant 0 : index
    %13 = vector.load %arg2[%c0_4, %c0_5] : memref<1x256xf32, #tpu.memory_space<vmem>>, vector<1x256xf32>
    %14 = vector.broadcast %13 : vector<1x256xf32> to vector<8x256xf32>
    %15 = arith.addf %12, %14 : vector<8x256xf32>
    %cst_6 = arith.constant 0.000000e+00 : f32
    %16 = vector.broadcast %cst_6 : f32 to vector<8x256xf32>
    %17 = arith.maximumf %15, %16 : vector<8x256xf32>
    %c0_7 = arith.constant 0 : index
    %c0_8 = arith.constant 0 : index
    %18 = vector.load %arg3[%c0_7, %c0_8] : memref<256x1536xf32, #tpu.memory_space<vmem>>, vector<256x1536xf32>
    %cst_9 = arith.constant dense<0.000000e+00> : vector<8x1536xf32>
    %19 = tpu.matmul %17, %18, %cst_9 {dimension_numbers = #tpu.dot_dimension_numbers<[1], [0], [0], [1], [0, 0, 1, 1], [], []>} : vector<8x256xf32>, vector<256x1536xf32>, vector<8x1536xf32> -> vector<8x1536xf32>
    %20 = vector.extract_strided_slice %19 {offsets = [0, 0], sizes = [8, 512], strides = [1, 1]} : vector<8x1536xf32> to vector<8x512xf32>
    %21 = vector.extract_strided_slice %19 {offsets = [0, 512], sizes = [8, 512], strides = [1, 1]} : vector<8x1536xf32> to vector<8x512xf32>
    %22 = vector.extract_strided_slice %19 {offsets = [0, 1024], sizes = [8, 512], strides = [1, 1]} : vector<8x1536xf32> to vector<8x512xf32>
    %cst_10 = arith.constant 0.000000e+00 : f32
    %23 = vector.broadcast %cst_10 : f32 to vector<2x512xf32>
    %24 = vector.extract_strided_slice %20 {offsets = [0, 0], sizes = [6, 512], strides = [1, 1]} : vector<8x512xf32> to vector<6x512xf32>
    %25 = tpu.concatenate %23, %24 in 0 : vector<2x512xf32>, vector<6x512xf32> -> vector<8x512xf32>
    %26 = vector.extract_strided_slice %22 {offsets = [2, 0], sizes = [6, 512], strides = [1, 1]} : vector<8x512xf32> to vector<6x512xf32>
    %27 = tpu.concatenate %26, %23 in 0 : vector<6x512xf32>, vector<2x512xf32> -> vector<8x512xf32>
    %28 = arith.addf %21, %25 : vector<8x512xf32>
    %29 = arith.addf %28, %27 : vector<8x512xf32>
    %c0_11 = arith.constant 0 : index
    %c0_12 = arith.constant 0 : index
    %30 = vector.load %arg4[%c0_11, %c0_12] : memref<1x512xf32, #tpu.memory_space<vmem>>, vector<1x512xf32>
    %31 = vector.broadcast %30 : vector<1x512xf32> to vector<8x512xf32>
    %32 = arith.addf %29, %31 : vector<8x512xf32>
    %cst_13 = arith.constant 0.000000e+00 : f32
    %33 = vector.broadcast %cst_13 : f32 to vector<8x512xf32>
    %34 = arith.maximumf %32, %33 : vector<8x512xf32>
    %cst_14 = arith.constant 0.000000e+00 : f32
    %35 = vector.broadcast %cst_14 : f32 to vector<2x24xf32>
    %c0_15 = arith.constant 0 : index
    %c0_16 = arith.constant 0 : index
    %36 = vector.load %arg6[%c0_15, %c0_16] : memref<1x24xf32, #tpu.memory_space<vmem>>, vector<1x24xf32>
    %37 = vector.broadcast %36 : vector<1x24xf32> to vector<2x24xf32>
    %38 = arith.addf %35, %37 : vector<2x24xf32>
    %39 = vector.extract_strided_slice %34 {offsets = [0, 0], sizes = [2, 512], strides = [1, 1]} : vector<8x512xf32> to vector<2x512xf32>
    %c0_17 = arith.constant 0 : index
    %c0_18 = arith.constant 0 : index
    %c0_19 = arith.constant 0 : index
    %40 = vector.load %arg5[%c0_17, %c0_18, %c0_19] : memref<4x512x24xf32, #tpu.memory_space<vmem>>, vector<1x512x24xf32>
    %41 = vector.shape_cast %40 : vector<1x512x24xf32> to vector<512x24xf32>
    %cst_20 = arith.constant dense<0.000000e+00> : vector<2x24xf32>
    %42 = tpu.matmul %39, %41, %cst_20 {dimension_numbers = #tpu.dot_dimension_numbers<[1], [0], [0], [1], [0, 0, 1, 1], [], []>} : vector<2x512xf32>, vector<512x24xf32>, vector<2x24xf32> -> vector<2x24xf32>
    %43 = arith.addf %38, %42 : vector<2x24xf32>
    %44 = vector.extract_strided_slice %34 {offsets = [2, 0], sizes = [2, 512], strides = [1, 1]} : vector<8x512xf32> to vector<2x512xf32>
    %c1 = arith.constant 1 : index
    %c0_21 = arith.constant 0 : index
    %c0_22 = arith.constant 0 : index
    %45 = vector.load %arg5[%c1, %c0_21, %c0_22] : memref<4x512x24xf32, #tpu.memory_space<vmem>>, vector<1x512x24xf32>
    %46 = vector.shape_cast %45 : vector<1x512x24xf32> to vector<512x24xf32>
    %cst_23 = arith.constant dense<0.000000e+00> : vector<2x24xf32>
    %47 = tpu.matmul %44, %46, %cst_23 {dimension_numbers = #tpu.dot_dimension_numbers<[1], [0], [0], [1], [0, 0, 1, 1], [], []>} : vector<2x512xf32>, vector<512x24xf32>, vector<2x24xf32> -> vector<2x24xf32>
    %48 = arith.addf %43, %47 : vector<2x24xf32>
    %49 = vector.extract_strided_slice %34 {offsets = [4, 0], sizes = [2, 512], strides = [1, 1]} : vector<8x512xf32> to vector<2x512xf32>
    %c2 = arith.constant 2 : index
    %c0_24 = arith.constant 0 : index
    %c0_25 = arith.constant 0 : index
    %50 = vector.load %arg5[%c2, %c0_24, %c0_25] : memref<4x512x24xf32, #tpu.memory_space<vmem>>, vector<1x512x24xf32>
    %51 = vector.shape_cast %50 : vector<1x512x24xf32> to vector<512x24xf32>
    %cst_26 = arith.constant dense<0.000000e+00> : vector<2x24xf32>
    %52 = tpu.matmul %49, %51, %cst_26 {dimension_numbers = #tpu.dot_dimension_numbers<[1], [0], [0], [1], [0, 0, 1, 1], [], []>} : vector<2x512xf32>, vector<512x24xf32>, vector<2x24xf32> -> vector<2x24xf32>
    %53 = arith.addf %48, %52 : vector<2x24xf32>
    %54 = vector.extract_strided_slice %34 {offsets = [6, 0], sizes = [2, 512], strides = [1, 1]} : vector<8x512xf32> to vector<2x512xf32>
    %c3 = arith.constant 3 : index
    %c0_27 = arith.constant 0 : index
    %c0_28 = arith.constant 0 : index
    %55 = vector.load %arg5[%c3, %c0_27, %c0_28] : memref<4x512x24xf32, #tpu.memory_space<vmem>>, vector<1x512x24xf32>
    %56 = vector.shape_cast %55 : vector<1x512x24xf32> to vector<512x24xf32>
    %cst_29 = arith.constant dense<0.000000e+00> : vector<2x24xf32>
    %57 = tpu.matmul %54, %56, %cst_29 {dimension_numbers = #tpu.dot_dimension_numbers<[1], [0], [0], [1], [0, 0, 1, 1], [], []>} : vector<2x512xf32>, vector<512x24xf32>, vector<2x24xf32> -> vector<2x24xf32>
    %58 = arith.addf %53, %57 : vector<2x24xf32>
    %c0_30 = arith.constant 0 : index
    %c0_31 = arith.constant 0 : index
    %59 = vector.load %arg7[%c0_30, %c0_31] : memref<2x24xf32, #tpu.memory_space<vmem>>, vector<2x24xf32>
    tpu.vector_store %arg7[%c0_30, %c0_31], %58 {strides = array<i32>} : memref<2x24xf32, #tpu.memory_space<vmem>>, vector<2x24xf32>,
    return
  }
}

</mosaic_0001>

<bundles_post_ra>
// kernel: cnn_model_forward.1
= control target key start
LH: loop header
LB: loop body
LE: loop exit
PB: predicated region body
PF: predicated region fallthrough
CT: control target
= control target key end

     0   :  { %12 = vsyncpa [#allocation3], 0  ;;  %s3651_s0 = inlined_call_operand.vmem [shape: f32[8,32], index: 0, kind: input, shape index: {}]   ;;  %s3652_s1 = inlined_call_operand.hbm [shape: f32[32,768], index: 1, kind: input, shape index: {}]   ;;  %s3653_s2 = inlined_call_operand.hbm [shape: f32[1,256], index: 2, kind: input, shape index: {}]   ;;  %s3654_s3 = inlined_call_operand.hbm [shape: f32[256,1536], index: 3, kind: input, shape index: {}]   ;;  %s3655_s4 = inlined_call_operand.hbm [shape: f32[1,512], index: 4, kind: input, shape index: {}]   ;;  %s3656_s5 = inlined_call_operand.vmem [shape: f32[4,512,24], index: 5, kind: input, shape index: {}]   ;;  %s3657_s6 = inlined_call_operand.hbm [shape: f32[1,24], index: 6, kind: input, shape index: {}]   ;;  %s3658_s7 = inlined_call_operand.hbm [shape: f32[2,24], index: 7, kind: output, shape index: {}]  }
   0x1   :  { %13 = vsyncpa [#allocation6], 0 }
   0x2   :  { %14 = vsyncpa [#allocation9], 0 }
   0x3   :  { %15 = vsyncpa [#allocation4], 0  ;;  %s2742_s24 = smov [#allocation5]   ;;  %s2743_s26 = smov [#allocation8]  }
   0x4   :  { %s36_s25 = sshll.u32 %s2742_s24, 4  ;;  %s58_s27 = sshll.u32 %s2743_s26, 4  ;;  %s37_s25 = int_to_ptr.vmem [resolvable:$true] %s36_s25  ;;  %s59_s27 = int_to_ptr.vmem [resolvable:$true] %s58_s27 }
   0x5   :  { %s2622_s28 = scalar_lea.vmem %s37_s25, 32  ;;  %p2627_p1 = scmp.lt.s32.totalorder %s37_s25, %s37_s25 }
   0x6   :  { %p2623_p0 = scmp.ne.s32.totalorder %s37_s25, %s2622_s28  ;;  %p2628_p2 = scmp.lt.s32.totalorder %s2622_s28, %s2622_s28 }
   0x8   :  { %p2629_p3 = por %p2628_p2, %p2627_p1 }
   0xa   :  { %p2630_p4 = pnand %p2629_p3, %p2623_p0 }
   0xc   :  { %2633 = shalt.err (!%p2630_p4)
}
   0xd   :  { %39 = dma.hbm_to_vmem [thread:$0]  %s3653_s2, 32, %s37_s25, [#allocation6]  }
   0xe   :  { %s2642_s8 = scalar_lea.vmem %s59_s27, 64  ;;  %p2647_p6 = scmp.lt.s32.totalorder %s59_s27, %s59_s27 }
   0xf   :  { %p2643_p5 = scmp.ne.s32.totalorder %s59_s27, %s2642_s8  ;;  %p2648_p7 = scmp.lt.s32.totalorder %s2642_s8, %s2642_s8 }
  0x11   :  { %p2649_p8 = por %p2648_p7, %p2647_p6 }
  0x13   :  { %p2650_p9 = pnand %p2649_p8, %p2643_p5 }
  0x15   :  { %2653 = shalt.err (!%p2650_p9)
}
  0x16   :  { %61 = dma.hbm_to_vmem [thread:$0]  %s3655_s4, 64, %s59_s27, [#allocation9]  }
  0x17   :  { %s2744_s11 = smov [#allocation2]  }
  0x18   :  { %s23_s12 = sshll.u32 %s2744_s11, 4  ;;  %s24_s12 = int_to_ptr.vmem [resolvable:$true] %s23_s12 }
  0x19   :  { %s2662_s13 = scalar_lea.vmem %s24_s12, 3072  ;;  %p2667_p11 = scmp.lt.s32.totalorder %s24_s12, %s24_s12 }
  0x1a   :  { %p2663_p10 = scmp.ne.s32.totalorder %s24_s12, %s2662_s13  ;;  %p2668_p12 = scmp.lt.s32.totalorder %s2662_s13, %s2662_s13 }
  0x1c   :  { %p2669_p13 = por %p2668_p12, %p2667_p11 }
  0x1e   :  { %p2670_p0 = pnand %p2669_p13, %p2663_p10 }
  0x20   :  { %2673 = shalt.err (!%p2670_p0)
}
  0x21   :  { %s2745_s2 = smov 768   ;;  %s2746_s14 = smov 48  }
  0x22   :  { %29 = dma.hbm_to_vmem [thread:$0]  %s3652_s1, 3072, %s24_s12, [#allocation3], %s2745_s2, %s2745_s2, %s2746_s14  }
  0x23   :  { %s2747_s17 = smov [#allocation7]  }
  0x24   :  { %s45_s18 = sshll.u32 %s2747_s17, 4  ;;  %s46_s18 = int_to_ptr.vmem [resolvable:$true] %s45_s18 }
  0x25   :  { %s2682_s4 = scalar_lea.vmem %s46_s18, 49152  ;;  %p2687_p2 = scmp.lt.s32.totalorder %s46_s18, %s46_s18 }
  0x26   :  { %p2683_p1 = scmp.ne.s32.totalorder %s46_s18, %s2682_s4  ;;  %p2688_p3 = scmp.lt.s32.totalorder %s2682_s4, %s2682_s4 }
  0x28   :  { %p2689_p4 = por %p2688_p3, %p2687_p2 }
  0x2a   :  { %p2690_p5 = pnand %p2689_p4, %p2683_p1 }
  0x2c   :  { %2693 = shalt.err (!%p2690_p5)
}
  0x2d   :  { %s2748_s19 = smov 1536   ;;  %s2749_s20 = smov 96  }
  0x2e   :  { %51 = dma.hbm_to_vmem [thread:$0]  %s3654_s3, 49152, %s46_s18, [#allocation6], %s2748_s19, %s2748_s19, %s2749_s20  }
  0x2f   :  { %s2750_s23 = smov [#allocation10]  }
  0x30   :  { %s70_s24 = sshll.u32 %s2750_s23, 4  ;;  %s71_s24 = int_to_ptr.vmem [resolvable:$true] %s70_s24 }
  0x31   :  { %s2702_s1 = scalar_lea.vmem %s71_s24, 16  ;;  %s2706_s25 = scalar_lea.vmem %s71_s24, 32 }
  0x32   :  { %p2703_p6 = scmp.ne.s32.totalorder %s71_s24, %s2702_s1  ;;  %p2707_p7 = scmp.lt.s32.totalorder %s71_s24, %s71_s24 }
  0x33   :  { %p2708_p8 = scmp.lt.s32.totalorder %s2706_s25, %s2702_s1 }
  0x35   :  { %p2709_p9 = por %p2708_p8, %p2707_p7 }
  0x37   :  { %p2710_p10 = pnand %p2709_p9, %p2703_p6 }
  0x39   :  { %2713 = shalt.err (!%p2710_p10)
}
  0x3a   :  { %73 = dma.hbm_to_vmem [thread:$0]  %s3657_s6, 16, %s71_s24, [#allocation9]  }
  0x3b   :  { %2734 = dma.done.wait [#allocation3], 3072  }
  0x3c   :  { %2735 = vsyncadd [#allocation3], 4294964224 }
  0x3d   :  { %2736 = dma.done.wait [#allocation6], 49184  }
  0x3e   :  { %2737 = vsyncadd [#allocation6], 4294918112 }
  0x3f   :  { %2738 = dma.done.wait [#allocation9], 80  }
  0x40   :  { %2739 = vsyncadd [#allocation9], 4294967216  ;;  %v2751_v0 = vmov 0.0   ;;  %v109_v1 = vld [vmem:[#allocation2 + $0x98] sm:$0xff]  ;;  %v108_v2 = vld [vmem:[#allocation2 + $0x90] sm:$0xff]  ;;  %vm114_vm0 = vcmask 261120  }
  0x41   :  { %182 = vmatprep.mubr.f32.mxu0 %v2751_v0  ;;  %253 = vmatprep.mubr.f32.mxu1 %v2751_v0  ;;  %v103_v3 = vld [vmem:[#allocation2 + $0x68] sm:$0xff]  ;;  %v102_v4 = vld [vmem:[#allocation2 + $0x60] sm:$0xff]  ;;  %v97_v6 = vld [vmem:[#allocation2 + $0x38] sm:$0xff]  ;;  %vm337_vm1 = vcmask 1041408   ;;  %vm346_vm2 = vcmask 1045504   ;;  %vm2108_vm3 = vcmask 189440  }
  0x42   :  { %142 = vmatprep.subr.mxu0 %v109_v1  ;;  %v111_v5 = vld [vmem:[#allocation2 + $0xa8] sm:$0xff]  ;;  %v110_v7 = vld [vmem:[#allocation2 + $0xa0] sm:$0xff]  ;;  %v105_v8 = vld [vmem:[#allocation2 + $0x78] sm:$0xff] }
  0x43   :  { %143 = vmatpush1.msra.mxu0 %v108_v2  ;;  %213 = vmatprep.subr.mxu1 %v111_v5  ;;  %v96_v9 = vld [vmem:[#allocation2 + $0x30] sm:$0xff]  ;;  %v91_v11 = vld [vmem:[#allocation2 + $0x8] sm:$0xff]  ;;  %v98_v13 = vld [vmem:[#allocation2 + $0x40] sm:$0xff] }
  0x44   :  { %144 = vmatprep.subr.mxu0 %v103_v3  ;;  %214 = vmatpush1.msra.mxu1 %v110_v7  ;;  %v104_v10 = vld [vmem:[#allocation2 + $0x70] sm:$0xff]  ;;  %v99_v12 = vld [vmem:[#allocation2 + $0x48] sm:$0xff]  ;;  %v90_v14 = vld [vmem:[#allocation2] sm:$0xff] }
  0x45   :  { %145 = vmatpush1.msra.mxu0 %v102_v4  ;;  %215 = vmatprep.subr.mxu1 %v105_v8  ;;  %v93_v15 = vld [vmem:[#allocation2 + $0x18] sm:$0xff]  ;;  %v89_v16 = vld [vmem:[%s3651_s0] sm:$0xff]  ;;  %v112_v18 = vld [vmem:[#allocation2 + $0xb0] sm:$0xff] }
  0x46   :  { %146 = vmatprep.subr.mxu0 %v97_v6  ;;  %216 = vmatpush1.msra.mxu1 %v104_v10  ;;  %v113_v17 = vld [vmem:[#allocation2 + $0xb8] sm:$0xff]  ;;  %v92_v19 = vld [vmem:[#allocation2 + $0x10] sm:$0xff]  ;;  %v107_v20 = vld [vmem:[#allocation2 + $0x88] sm:$0xff] }
  0x47   :  { %147 = vmatpush1.msra.mxu0 %v96_v9  ;;  %217 = vmatprep.subr.mxu1 %v99_v12  ;;  %v106_v21 = vld [vmem:[#allocation2 + $0x80] sm:$0xff]  ;;  %v101_v22 = vld [vmem:[#allocation2 + $0x58] sm:$0xff]  ;;  %v550_v23 = vld [vmem:[#allocation7 + $0x5a8] sm:$0xff] }
  0x48   :  { %148 = vmatprep.subr.mxu0 %v91_v11  ;;  %218 = vmatpush1.msra.mxu1 %v98_v13  ;;  %v100_v24 = vld [vmem:[#allocation2 + $0x50] sm:$0xff]  ;;  %v549_v25 = vld [vmem:[#allocation7 + $0x5a0] sm:$0xff]  ;;  %v552_v30 = vld [vmem:[#allocation7 + $0x5b8] sm:$0xff] }
  0x49   :  { %149 = vmatpush1.msra.mxu0 %v90_v14  ;;  %219 = vmatprep.subr.mxu1 %v93_v15  ;;  %v95_v26 = vld [vmem:[#allocation2 + $0x28] sm:$0xff]  ;;  %v94_v28 = vld [vmem:[#allocation2 + $0x20] sm:$0xff]  ;;  %v551_v31 = vld [vmem:[#allocation7 + $0x5b0] sm:$0xff] }
  0x4a   :  { %2127 = vmatmul.mubr.msk.f32.vlgmr.msra.gmra.mxu0 %vm114_vm0, %v89_v16  ;;  %284 = vmatprep.subr.mxu0 %v113_v17  ;;  %v538_v27 = vld [vmem:[#allocation7 + $0x548] sm:$0xff]  ;;  %v537_v29 = vld [vmem:[#allocation7 + $0x540] sm:$0xff]  ;;  %v540_v33 = vld [vmem:[#allocation7 + $0x558] sm:$0xff] }
  0x4b   :  { %285 = vmatpush1.msra.mxu0 %v112_v18  ;;  %220 = vmatpush1.msra.mxu1 %v92_v19  ;;  %v526_v32 = vld [vmem:[#allocation7 + $0x4e8] sm:$0xff]  ;;  %v525_v34 = vld [vmem:[#allocation7 + $0x4e0] sm:$0xff]  ;;  %v539_v35 = vld [vmem:[#allocation7 + $0x550] sm:$0xff] }
  0x4c   :  { %286 = vmatprep.subr.mxu0 %v107_v20  ;;  %2128 = vmatmul.mubr.msk.f32.vlgmr.msra.gmra.mxu1 %vm114_vm0, %v89_v16  ;;  %v514_v36 = vld [vmem:[#allocation7 + $0x488] sm:$0xff]  ;;  %v528_v37 = vld [vmem:[#allocation7 + $0x4f8] sm:$0xff]  ;;  %v513_v38 = vld [vmem:[#allocation7 + $0x480] sm:$0xff] }
  0x4d   :  { %287 = vmatpush1.msra.mxu0 %v106_v21  ;;  %324 = vmatprep.mubr.f32.mxu0 %v2751_v0  ;;  %v527_v39 = vld [vmem:[#allocation7 + $0x4f0] sm:$0xff]  ;;  %v502_v40 = vld [vmem:[#allocation7 + $0x428] sm:$0xff]  ;;  %v516_v41 = vld [vmem:[#allocation7 + $0x498] sm:$0xff] }
  0x4e   :  { %288 = vmatprep.subr.mxu0 %v101_v22  ;;  %753 = vmatprep.subr.mxu1 %v550_v23  ;;  %v501_v42 = vld [vmem:[#allocation7 + $0x420] sm:$0xff]  ;;  %v515_v43 = vld [vmem:[#allocation7 + $0x490] sm:$0xff]  ;;  %v490_v44 = vld [vmem:[#allocation7 + $0x3c8] sm:$0xff] }
  0x4f   :  { %289 = vmatpush1.msra.mxu0 %v100_v24  ;;  %754 = vmatpush1.msra.mxu1 %v549_v25  ;;  %v504_v45 = vld [vmem:[#allocation7 + $0x438] sm:$0xff]  ;;  %v489_v46 = vld [vmem:[#allocation7 + $0x3c0] sm:$0xff]  ;;  %v503_v47 = vld [vmem:[#allocation7 + $0x430] sm:$0xff] }
  0x50   :  { %290 = vmatprep.subr.mxu0 %v95_v26  ;;  %755 = vmatprep.subr.mxu1 %v538_v27  ;;  %v478_v48 = vld [vmem:[#allocation7 + $0x368] sm:$0xff]  ;;  %v492_v49 = vld [vmem:[#allocation7 + $0x3d8] sm:$0xff]  ;;  %v477_v50 = vld [vmem:[#allocation7 + $0x360] sm:$0xff] }
  0x51   :  { %291 = vmatpush1.msra.mxu0 %v94_v28  ;;  %756 = vmatpush1.msra.mxu1 %v537_v29  ;;  %v491_v51 = vld [vmem:[#allocation7 + $0x3d0] sm:$0xff]  ;;  %v466_v52 = vld [vmem:[#allocation7 + $0x308] sm:$0xff]  ;;  %v480_v53 = vld [vmem:[#allocation7 + $0x378] sm:$0xff] }
  0x52   :  { %2129 = vmatmul.mubr.msk.f32.vlgmr.msra.gmra.mxu0 %vm114_vm0, %v89_v16  ;;  %824 = vmatprep.subr.mxu0 %v552_v30  ;;  %v465_v54 = vld [vmem:[#allocation7 + $0x300] sm:$0xff]  ;;  %v479_v55 = vld [vmem:[#allocation7 + $0x370] sm:$0xff]  ;;  %v454_v56 = vld [vmem:[#allocation7 + $0x2a8] sm:$0xff] }
  0x53   :  { %825 = vmatpush1.msra.mxu0 %v551_v31  ;;  %757 = vmatprep.subr.mxu1 %v526_v32  ;;  %v468_v57 = vld [vmem:[#allocation7 + $0x318] sm:$0xff]  ;;  %v453_v58 = vld [vmem:[#allocation7 + $0x2a0] sm:$0xff]  ;;  %v467_v59 = vld [vmem:[#allocation7 + $0x310] sm:$0xff] }
  0x54   :  { %826 = vmatprep.subr.mxu0 %v540_v33  ;;  %758 = vmatpush1.msra.mxu1 %v525_v34  ;;  %v442_v60 = vld [vmem:[#allocation7 + $0x248] sm:$0xff]  ;;  %v456_v61 = vld [vmem:[#allocation7 + $0x2b8] sm:$0xff]  ;;  %v441_v62 = vld [vmem:[#allocation7 + $0x240] sm:$0xff] }
  0x55   :  { %827 = vmatpush1.msra.mxu0 %v539_v35  ;;  %759 = vmatprep.subr.mxu1 %v514_v36  ;;  %v455_v63 = vld [vmem:[#allocation7 + $0x2b0] sm:$0xff]  ;;  %v430_v0 = vld [vmem:[#allocation7 + $0x1e8] sm:$0xff]  ;;  %v444_v1 = vld [vmem:[#allocation7 + $0x258] sm:$0xff] }
  0x56   :  { %828 = vmatprep.subr.mxu0 %v528_v37  ;;  %760 = vmatpush1.msra.mxu1 %v513_v38  ;;  %v429_v2 = vld [vmem:[#allocation7 + $0x1e0] sm:$0xff]  ;;  %v443_v3 = vld [vmem:[#allocation7 + $0x250] sm:$0xff]  ;;  %v418_v4 = vld [vmem:[#allocation7 + $0x188] sm:$0xff] }
  0x57   :  { %829 = vmatpush1.msra.mxu0 %v527_v39  ;;  %761 = vmatprep.subr.mxu1 %v502_v40  ;;  %v432_v5 = vld [vmem:[#allocation7 + $0x1f8] sm:$0xff]  ;;  %v417_v6 = vld [vmem:[#allocation7 + $0x180] sm:$0xff]  ;;  %v431_v7 = vld [vmem:[#allocation7 + $0x1f0] sm:$0xff] }
  0x58   :  { %830 = vmatprep.subr.mxu0 %v516_v41  ;;  %762 = vmatpush1.msra.mxu1 %v501_v42  ;;  %v406_v8 = vld [vmem:[#allocation7 + $0x128] sm:$0xff]  ;;  %v420_v9 = vld [vmem:[#allocation7 + $0x198] sm:$0xff]  ;;  %v405_v10 = vld [vmem:[#allocation7 + $0x120] sm:$0xff] }
  0x59   :  { %831 = vmatpush1.msra.mxu0 %v515_v43  ;;  %763 = vmatprep.subr.mxu1 %v490_v44  ;;  %v419_v11 = vld [vmem:[#allocation7 + $0x190] sm:$0xff]  ;;  %v394_v12 = vld [vmem:[#allocation7 + $0xc8] sm:$0xff]  ;;  %v408_v13 = vld [vmem:[#allocation7 + $0x138] sm:$0xff] }
  0x5a   :  { %832 = vmatprep.subr.mxu0 %v504_v45  ;;  %764 = vmatpush1.msra.mxu1 %v489_v46  ;;  %v393_v14 = vld [vmem:[#allocation7 + $0xc0] sm:$0xff]  ;;  %v407_v15 = vld [vmem:[#allocation7 + $0x130] sm:$0xff]  ;;  %v382_v16 = vld [vmem:[#allocation7 + $0x68] sm:$0xff] }
  0x5b   :  { %833 = vmatpush1.msra.mxu0 %v503_v47  ;;  %765 = vmatprep.subr.mxu1 %v478_v48  ;;  %v396_v17 = vld [vmem:[#allocation7 + $0xd8] sm:$0xff]  ;;  %v381_v18 = vld [vmem:[#allocation7 + $0x60] sm:$0xff]  ;;  %v395_v19 = vld [vmem:[#allocation7 + $0xd0] sm:$0xff] }
  0x5c   :  { %834 = vmatprep.subr.mxu0 %v492_v49  ;;  %766 = vmatpush1.msra.mxu1 %v477_v50  ;;  %v370_v20 = vld [vmem:[#allocation7 + $0x8] sm:$0xff]  ;;  %v384_v21 = vld [vmem:[#allocation7 + $0x78] sm:$0xff]  ;;  %v369_v22 = vld [vmem:[#allocation7] sm:$0xff] }
  0x5d   :  { %835 = vmatpush1.msra.mxu0 %v491_v51  ;;  %767 = vmatprep.subr.mxu1 %v466_v52  ;;  %v383_v23 = vld [vmem:[#allocation7 + $0x70] sm:$0xff]  ;;  %v742_v24 = vld [vmem:[#allocation7 + $0xba8] sm:$0xff]  ;;  %v372_v25 = vld [vmem:[#allocation7 + $0x18] sm:$0xff] }
  0x5e   :  { %836 = vmatprep.subr.mxu0 %v480_v53  ;;  %768 = vmatpush1.msra.mxu1 %v465_v54  ;;  %v741_v26 = vld [vmem:[#allocation7 + $0xba0] sm:$0xff]  ;;  %v371_v27 = vld [vmem:[#allocation7 + $0x10] sm:$0xff]  ;;  %v730_v28 = vld [vmem:[#allocation7 + $0xb48] sm:$0xff] }
  0x5f   :  { %837 = vmatpush1.msra.mxu0 %v479_v55  ;;  %769 = vmatprep.subr.mxu1 %v454_v56  ;;  %v744_v29 = vld [vmem:[#allocation7 + $0xbb8] sm:$0xff]  ;;  %v729_v30 = vld [vmem:[#allocation7 + $0xb40] sm:$0xff]  ;;  %v743_v31 = vld [vmem:[#allocation7 + $0xbb0] sm:$0xff] }
  0x60   :  { %838 = vmatprep.subr.mxu0 %v468_v57  ;;  %770 = vmatpush1.msra.mxu1 %v453_v58  ;;  %v718_v32 = vld [vmem:[#allocation7 + $0xae8] sm:$0xff]  ;;  %v732_v33 = vld [vmem:[#allocation7 + $0xb58] sm:$0xff]  ;;  %v717_v34 = vld [vmem:[#allocation7 + $0xae0] sm:$0xff] }
  0x61   :  { %839 = vmatpush1.msra.mxu0 %v467_v59  ;;  %771 = vmatprep.subr.mxu1 %v442_v60  ;;  %v731_v35 = vld [vmem:[#allocation7 + $0xb50] sm:$0xff]  ;;  %v706_v36 = vld [vmem:[#allocation7 + $0xa88] sm:$0xff]  ;;  %v720_v37 = vld [vmem:[#allocation7 + $0xaf8] sm:$0xff] }
  0x62   :  { %840 = vmatprep.subr.mxu0 %v456_v61  ;;  %772 = vmatpush1.msra.mxu1 %v441_v62  ;;  %v705_v38 = vld [vmem:[#allocation7 + $0xa80] sm:$0xff]  ;;  %v719_v39 = vld [vmem:[#allocation7 + $0xaf0] sm:$0xff]  ;;  %v694_v40 = vld [vmem:[#allocation7 + $0xa28] sm:$0xff] }
  0x63   :  { %841 = vmatpush1.msra.mxu0 %v455_v63  ;;  %773 = vmatprep.subr.mxu1 %v430_v0  ;;  %v708_v41 = vld [vmem:[#allocation7 + $0xa98] sm:$0xff]  ;;  %v693_v42 = vld [vmem:[#allocation7 + $0xa20] sm:$0xff]  ;;  %v707_v43 = vld [vmem:[#allocation7 + $0xa90] sm:$0xff] }
  0x64   :  { %842 = vmatprep.subr.mxu0 %v444_v1  ;;  %774 = vmatpush1.msra.mxu1 %v429_v2  ;;  %v682_v44 = vld [vmem:[#allocation7 + $0x9c8] sm:$0xff]  ;;  %v696_v45 = vld [vmem:[#allocation7 + $0xa38] sm:$0xff]  ;;  %v681_v46 = vld [vmem:[#allocation7 + $0x9c0] sm:$0xff] }
  0x65   :  { %843 = vmatpush1.msra.mxu0 %v443_v3  ;;  %775 = vmatprep.subr.mxu1 %v418_v4  ;;  %v695_v47 = vld [vmem:[#allocation7 + $0xa30] sm:$0xff]  ;;  %v684_v48 = vld [vmem:[#allocation7 + $0x9d8] sm:$0xff]  ;;  %v670_v50 = vld [vmem:[#allocation7 + $0x968] sm:$0xff] }
  0x66   :  { %844 = vmatprep.subr.mxu0 %v432_v5  ;;  %776 = vmatpush1.msra.mxu1 %v417_v6  ;;  %v683_v49 = vld [vmem:[#allocation7 + $0x9d0] sm:$0xff]  ;;  %v672_v51 = vld [vmem:[#allocation7 + $0x978] sm:$0xff]  ;;  %v669_v52 = vld [vmem:[#allocation7 + $0x960] sm:$0xff] }
  0x67   :  { %845 = vmatpush1.msra.mxu0 %v431_v7  ;;  %777 = vmatprep.subr.mxu1 %v406_v8  ;;  %v671_v53 = vld [vmem:[#allocation7 + $0x970] sm:$0xff]  ;;  %v658_v54 = vld [vmem:[#allocation7 + $0x908] sm:$0xff]  ;;  %v660_v55 = vld [vmem:[#allocation7 + $0x918] sm:$0xff] }
  0x68   :  { %846 = vmatprep.subr.mxu0 %v420_v9  ;;  %778 = vmatpush1.msra.mxu1 %v405_v10  ;;  %v657_v56 = vld [vmem:[#allocation7 + $0x900] sm:$0xff]  ;;  %v659_v57 = vld [vmem:[#allocation7 + $0x910] sm:$0xff]  ;;  %v646_v58 = vld [vmem:[#allocation7 + $0x8a8] sm:$0xff] }
  0x69   :  { %847 = vmatpush1.msra.mxu0 %v419_v11  ;;  %779 = vmatprep.subr.mxu1 %v394_v12  ;;  %v648_v59 = vld [vmem:[#allocation7 + $0x8b8] sm:$0xff]  ;;  %v645_v60 = vld [vmem:[#allocation7 + $0x8a0] sm:$0xff]  ;;  %v647_v61 = vld [vmem:[#allocation7 + $0x8b0] sm:$0xff] }
  0x6a   :  { %848 = vmatprep.subr.mxu0 %v408_v13  ;;  %780 = vmatpush1.msra.mxu1 %v393_v14  ;;  %v634_v62 = vld [vmem:[#allocation7 + $0x848] sm:$0xff]  ;;  %v636_v63 = vld [vmem:[#allocation7 + $0x858] sm:$0xff]  ;;  %v633_v0 = vld [vmem:[#allocation7 + $0x840] sm:$0xff] }
  0x6b   :  { %849 = vmatpush1.msra.mxu0 %v407_v15  ;;  %781 = vmatprep.subr.mxu1 %v382_v16  ;;  %v635_v1 = vld [vmem:[#allocation7 + $0x850] sm:$0xff]  ;;  %v622_v2 = vld [vmem:[#allocation7 + $0x7e8] sm:$0xff]  ;;  %v624_v3 = vld [vmem:[#allocation7 + $0x7f8] sm:$0xff] }
  0x6c   :  { %850 = vmatprep.subr.mxu0 %v396_v17  ;;  %782 = vmatpush1.msra.mxu1 %v381_v18  ;;  %v621_v4 = vld [vmem:[#allocation7 + $0x7e0] sm:$0xff]  ;;  %v623_v5 = vld [vmem:[#allocation7 + $0x7f0] sm:$0xff]  ;;  %v610_v6 = vld [vmem:[#allocation7 + $0x788] sm:$0xff] }
  0x6d   :  { %851 = vmatpush1.msra.mxu0 %v395_v19  ;;  %783 = vmatprep.subr.mxu1 %v370_v20  ;;  %v612_v7 = vld [vmem:[#allocation7 + $0x798] sm:$0xff]  ;;  %v609_v8 = vld [vmem:[#allocation7 + $0x780] sm:$0xff]  ;;  %v611_v9 = vld [vmem:[#allocation7 + $0x790] sm:$0xff] }
  0x6e   :  { %852 = vmatprep.subr.mxu0 %v384_v21  ;;  %784 = vmatpush1.msra.mxu1 %v369_v22  ;;  %v598_v10 = vld [vmem:[#allocation7 + $0x728] sm:$0xff]  ;;  %v600_v11 = vld [vmem:[#allocation7 + $0x738] sm:$0xff]  ;;  %v597_v12 = vld [vmem:[#allocation7 + $0x720] sm:$0xff] }
  0x6f   :  { %853 = vmatpush1.msra.mxu0 %v383_v23  ;;  %785 = vmatprep.subr.mxu1 %v742_v24  ;;  %v599_v13 = vld [vmem:[#allocation7 + $0x730] sm:$0xff]  ;;  %v586_v14 = vld [vmem:[#allocation7 + $0x6c8] sm:$0xff]  ;;  %v588_v15 = vld [vmem:[#allocation7 + $0x6d8] sm:$0xff] }
  0x70   :  { %854 = vmatprep.subr.mxu0 %v372_v25  ;;  %786 = vmatpush2.msra.mxu1 %v741_v26  ;;  %v585_v16 = vld [vmem:[#allocation7 + $0x6c0] sm:$0xff]  ;;  %v587_v17 = vld [vmem:[#allocation7 + $0x6d0] sm:$0xff]  ;;  %v574_v18 = vld [vmem:[#allocation7 + $0x668] sm:$0xff] }
  0x71   :  { %855 = vmatpush1.msra.mxu0 %v371_v27  ;;  %787 = vmatprep.subr.mxu1 %v730_v28  ;;  %v576_v19 = vld [vmem:[#allocation7 + $0x678] sm:$0xff]  ;;  %v573_v20 = vld [vmem:[#allocation7 + $0x660] sm:$0xff]  ;;  %v575_v21 = vld [vmem:[#allocation7 + $0x670] sm:$0xff]  ;;  %v355_v28 = vlaneseq }
  0x72   :  { %856 = vmatprep.subr.mxu0 %v744_v29  ;;  %788 = vmatpush2.msra.mxu1 %v729_v30  ;;  %v562_v22 = vld [vmem:[#allocation7 + $0x608] sm:$0xff]  ;;  %v564_v23 = vld [vmem:[#allocation7 + $0x618] sm:$0xff]  ;;  %v561_v24 = vld [vmem:[#allocation7 + $0x600] sm:$0xff] }
  0x73   :  { %857 = vmatpush2.msra.mxu0 %v743_v31  ;;  %789 = vmatprep.subr.mxu1 %v718_v32  ;;  %v563_v25 = vld [vmem:[#allocation7 + $0x610] sm:$0xff]  ;;  %v554_v26 = vld [vmem:[#allocation7 + $0x5c8] sm:$0xff]  ;;  %v556_v27 = vld [vmem:[#allocation7 + $0x5d8] sm:$0xff]  ;;  %v2814_v32 = vshrl.u32 %v355_v28, 7 }
  0x74   :  { %858 = vmatprep.subr.mxu0 %v732_v33  ;;  %790 = vmatpush2.msra.mxu1 %v717_v34  ;;  %v448_v28 = vld [vmem:[#allocation7 + $0x278] sm:$0xff] }
  0x75   :  { %859 = vmatpush2.msra.mxu0 %v731_v35  ;;  %791 = vmatprep.subr.mxu1 %v706_v36  ;;  %v357_v36 = vsub.s32 0, %v2814_v32 }
  0x76   :  { %860 = vmatprep.subr.mxu0 %v720_v37  ;;  %792 = vmatpush2.msra.mxu1 %v705_v38  ;;  %v353_v38 = vld [vmem:[#allocation5] sm:$0x3] }
  0x77   :  { %861 = vmatpush2.msra.mxu0 %v719_v39  ;;  %793 = vmatprep.subr.mxu1 %v694_v40  ;;  %v361_v39 = vsub.s32 1, %v2814_v32 }
  0x78   :  { %862 = vmatprep.subr.mxu0 %v708_v41  ;;  %794 = vmatpush2.msra.mxu1 %v693_v42 }
  0x79   :  { %863 = vmatpush2.msra.mxu0 %v707_v43  ;;  %795 = vmatprep.subr.mxu1 %v682_v44 }
  0x7a   :  { %864 = vmatprep.subr.mxu0 %v696_v45  ;;  %796 = vmatpush2.msra.mxu1 %v681_v46  ;;  %v358_v46 = vrot.slane %v353_v38, %v357_v36 }
  0x7b   :  { %865 = vmatpush2.msra.mxu0 %v695_v47  ;;  %797 = vmatprep.subr.mxu1 %v670_v50  ;;  %v362_v50 = vrot.slane %v353_v38, %v361_v39  ;;  %v424_v38 = vld [vmem:[#allocation7 + $0x1b8] sm:$0xff] }
  0x7c   :  { %866 = vmatprep.subr.mxu0 %v684_v48  ;;  %798 = vmatpush2.msra.mxu1 %v669_v52 }
  0x7d   :  { %867 = vmatpush2.msra.mxu0 %v683_v49  ;;  %799 = vmatprep.subr.mxu1 %v658_v54 }
  0x7e   :  { %868 = vmatprep.subr.mxu0 %v672_v51  ;;  %800 = vmatpush2.msra.mxu1 %v657_v56 }
  0x7f   :  { %869 = vmatpush2.msra.mxu0 %v671_v53  ;;  %801 = vmatprep.subr.mxu1 %v646_v58  ;;  %v555_v58 = vld [vmem:[#allocation7 + $0x5d0] sm:$0xff] }
  0x80   :  { %870 = vmatprep.subr.mxu0 %v660_v55  ;;  %802 = vmatpush2.msra.mxu1 %v645_v60  ;;  %v544_v60 = vld [vmem:[#allocation7 + $0x578] sm:$0xff] }
  0x81   :  { %871 = vmatpush2.msra.mxu0 %v659_v57  ;;  %803 = vmatprep.subr.mxu1 %v634_v62  ;;  %v553_v57 = vld [vmem:[#allocation7 + $0x5c0] sm:$0xff]  ;;  %v543_v62 = vld [vmem:[#allocation7 + $0x570] sm:$0xff] }
  0x82   :  { %872 = vmatprep.subr.mxu0 %v648_v59  ;;  %804 = vmatpush2.msra.mxu1 %v633_v0  ;;  %v542_v59 = vld [vmem:[#allocation7 + $0x568] sm:$0xff]  ;;  %v532_v0 = vld [vmem:[#allocation7 + $0x518] sm:$0xff] }
  0x83   :  { %873 = vmatpush2.msra.mxu0 %v647_v61  ;;  %805 = vmatprep.subr.mxu1 %v622_v2  ;;  %v541_v61 = vld [vmem:[#allocation7 + $0x560] sm:$0xff]  ;;  %v531_v2 = vld [vmem:[#allocation7 + $0x510] sm:$0xff] }
  0x84   :  { %874 = vmatprep.subr.mxu0 %v636_v63  ;;  %806 = vmatpush2.msra.mxu1 %v621_v4  ;;  %v530_v63 = vld [vmem:[#allocation7 + $0x508] sm:$0xff]  ;;  %v520_v4 = vld [vmem:[#allocation7 + $0x4b8] sm:$0xff] }
  0x85   :  { %875 = vmatpush2.msra.mxu0 %v635_v1  ;;  %807 = vmatprep.subr.mxu1 %v610_v6  ;;  %v529_v1 = vld [vmem:[#allocation7 + $0x500] sm:$0xff]  ;;  %v519_v6 = vld [vmem:[#allocation7 + $0x4b0] sm:$0xff] }
  0x86   :  { %876 = vmatprep.subr.mxu0 %v624_v3  ;;  %808 = vmatpush2.msra.mxu1 %v609_v8  ;;  %v518_v3 = vld [vmem:[#allocation7 + $0x4a8] sm:$0xff]  ;;  %v508_v8 = vld [vmem:[#allocation7 + $0x458] sm:$0xff] }
  0x87   :  { %877 = vmatpush2.msra.mxu0 %v623_v5  ;;  %809 = vmatprep.subr.mxu1 %v598_v10  ;;  %v517_v5 = vld [vmem:[#allocation7 + $0x4a0] sm:$0xff]  ;;  %v507_v10 = vld [vmem:[#allocation7 + $0x450] sm:$0xff] }
  0x88   :  { %878 = vmatprep.subr.mxu0 %v612_v7  ;;  %810 = vmatpush2.msra.mxu1 %v597_v12  ;;  %v506_v7 = vld [vmem:[#allocation7 + $0x448] sm:$0xff]  ;;  %v496_v12 = vld [vmem:[#allocation7 + $0x3f8] sm:$0xff] }
  0x89   :  { %879 = vmatpush2.msra.mxu0 %v611_v9  ;;  %811 = vmatprep.subr.mxu1 %v586_v14  ;;  %v505_v9 = vld [vmem:[#allocation7 + $0x440] sm:$0xff]  ;;  %v495_v14 = vld [vmem:[#allocation7 + $0x3f0] sm:$0xff] }
  0x8a   :  { %880 = vmatprep.subr.mxu0 %v600_v11  ;;  %812 = vmatpush2.msra.mxu1 %v585_v16  ;;  %v494_v11 = vld [vmem:[#allocation7 + $0x3e8] sm:$0xff]  ;;  %v484_v16 = vld [vmem:[#allocation7 + $0x398] sm:$0xff] }
  0x8b   :  { %881 = vmatpush2.msra.mxu0 %v599_v13  ;;  %813 = vmatprep.subr.mxu1 %v574_v18  ;;  %v493_v13 = vld [vmem:[#allocation7 + $0x3e0] sm:$0xff]  ;;  %v483_v18 = vld [vmem:[#allocation7 + $0x390] sm:$0xff] }
  0x8c   :  { %882 = vmatprep.subr.mxu0 %v588_v15  ;;  %814 = vmatpush2.msra.mxu1 %v573_v20  ;;  %v482_v15 = vld [vmem:[#allocation7 + $0x388] sm:$0xff]  ;;  %v472_v20 = vld [vmem:[#allocation7 + $0x338] sm:$0xff] }
  0x8d   :  { %883 = vmatpush2.msra.mxu0 %v587_v17  ;;  %815 = vmatprep.subr.mxu1 %v562_v22  ;;  %v481_v17 = vld [vmem:[#allocation7 + $0x380] sm:$0xff]  ;;  %v471_v22 = vld [vmem:[#allocation7 + $0x330] sm:$0xff] }
  0x8e   :  { %884 = vmatprep.subr.mxu0 %v576_v19  ;;  %816 = vmatpush2.msra.mxu1 %v561_v24  ;;  %v470_v19 = vld [vmem:[#allocation7 + $0x328] sm:$0xff]  ;;  %v460_v24 = vld [vmem:[#allocation7 + $0x2d8] sm:$0xff] }
  0x8f   :  { %885 = vmatpush2.msra.mxu0 %v575_v21  ;;  %895 = vmatprep.subr.mxu1 %v554_v26  ;;  %v469_v21 = vld [vmem:[#allocation7 + $0x320] sm:$0xff]  ;;  %v459_v26 = vld [vmem:[#allocation7 + $0x2d0] sm:$0xff] }
  0x90   :  { %886 = vmatprep.subr.mxu0 %v564_v23  ;;  %v458_v23 = vld [vmem:[#allocation7 + $0x2c8] sm:$0xff] }
  0x91   :  { %887 = vmatpush2.msra.mxu0 %v563_v25  ;;  %v457_v25 = vld [vmem:[#allocation7 + $0x2c0] sm:$0xff] }
  0x92   :  { %966 = vmatprep.subr.mxu0 %v556_v27  ;;  %v446_v27 = vld [vmem:[#allocation7 + $0x268] sm:$0xff] }
 0x10a   :  { %v184_v29 = vpop.f32.mrf.mxu0 }
 0x10b   :  { %v333_v31 = vrot.slane %v184_v29, 6  ;;  %v445_v29 = vld [vmem:[#allocation7 + $0x260] sm:$0xff] }
 0x10c   :  { %v186_v30 = vpop.f32.mrf.mxu0  ;;  %v255_v34 = vpop.f32.mrf.mxu1 }
 0x10d   :  { %v334_v33 = vrot.slane %v186_v30, 6  ;;  %v338_v35 = vsel %vm337_vm1, 0.0, %v333_v31  ;;  %v447_v30 = vld [vmem:[#allocation7 + $0x270] sm:$0xff]  ;;  %v434_v31 = vld [vmem:[#allocation7 + $0x208] sm:$0xff] }
 0x10e   :  { %v257_v40 = vpop.f32.mrf.mxu1  ;;  %v349_v43 = vadd.f32 %v338_v35, %v255_v34  ;;  %v433_v34 = vld [vmem:[#allocation7 + $0x200] sm:$0xff]  ;;  %v435_v35 = vld [vmem:[#allocation7 + $0x210] sm:$0xff] }
 0x10f   :  { %v339_v41 = vsel %vm337_vm1, 0.0, %v334_v33  ;;  %v436_v33 = vld [vmem:[#allocation7 + $0x218] sm:$0xff] }
 0x110   :  { %v350_v48 = vadd.f32 %v339_v41, %v257_v40  ;;  %v421_v40 = vld [vmem:[#allocation7 + $0x1a0] sm:$0xff]  ;;  %v423_v41 = vld [vmem:[#allocation7 + $0x1b0] sm:$0xff] }
 0x112   :  { %v326_v37 = vpop.f32.mrf.mxu0 }
 0x113   :  { %v342_v42 = vrot.slane %v326_v37, 2  ;;  %v422_v37 = vld [vmem:[#allocation7 + $0x1a8] sm:$0xff] }
 0x114   :  { %v328_v44 = vpop.f32.mrf.mxu0 }
 0x115   :  { %v347_v45 = vsel %vm346_vm2, %v342_v42, 0.0  ;;  %v343_v47 = vrot.slane %v328_v44, 2  ;;  %v410_v42 = vld [vmem:[#allocation7 + $0x148] sm:$0xff]  ;;  %v409_v44 = vld [vmem:[#allocation7 + $0x140] sm:$0xff] }
 0x116   :  { %v351_v49 = vadd.f32 %v349_v43, %v347_v45  ;;  %v412_v43 = vld [vmem:[#allocation7 + $0x158] sm:$0xff]  ;;  %v411_v45 = vld [vmem:[#allocation7 + $0x150] sm:$0xff] }
 0x117   :  { %v348_v51 = vsel %vm346_vm2, %v343_v47, 0.0  ;;  %v400_v47 = vld [vmem:[#allocation7 + $0xf8] sm:$0xff] }
 0x118   :  { %v352_v52 = vadd.f32 %v350_v48, %v348_v51  ;;  %v365_v53 = vadd.f32 %v358_v46, %v351_v49  ;;  %v398_v46 = vld [vmem:[#allocation7 + $0xe8] sm:$0xff]  ;;  %v397_v48 = vld [vmem:[#allocation7 + $0xe0] sm:$0xff]  ;;  %v399_v49 = vld [vmem:[#allocation7 + $0xf0] sm:$0xff] }
 0x119   :  { %v388_v51 = vld [vmem:[#allocation7 + $0x98] sm:$0xff] }
 0x11a   :  { %v366_v54 = vadd.f32 %v362_v50, %v352_v52  ;;  %v2828_v56 = vmax.f32 %v365_v53, 0.0  ;;  %v386_v50 = vld [vmem:[#allocation7 + $0x88] sm:$0xff]  ;;  %v385_v52 = vld [vmem:[#allocation7 + $0x80] sm:$0xff]  ;;  %v387_v53 = vld [vmem:[#allocation7 + $0x90] sm:$0xff] }
 0x11c   :  { %v2826_v55 = vmax.f32 %v366_v54, 0.0  ;;  %v374_v54 = vld [vmem:[#allocation7 + $0x28] sm:$0xff] }
 0x11e   :  { %817 = vmatprep.mubr.f32.mxu1 %v2826_v55  ;;  %888 = vmatprep.mubr.f32.mxu0 %v2826_v55 }
 0x11f   :  { %818 = vmatmul.mubr.f32.vlgmr.msra.gmra.mxu1 %v2828_v56  ;;  %889 = vmatmul.mubr.f32.vlgmr.msra.gmra.mxu0 %v2828_v56 }
 0x120   :  { %896 = vmatpush1.msra.mxu1 %v553_v57  ;;  %967 = vmatpush1.msra.mxu0 %v555_v58  ;;  %v376_v57 = vld [vmem:[#allocation7 + $0x38] sm:$0xff]  ;;  %v373_v58 = vld [vmem:[#allocation7 + $0x20] sm:$0xff] }
 0x121   :  { %897 = vmatprep.subr.mxu1 %v542_v59  ;;  %959 = vmatprep.mubr.f32.mxu1 %v2826_v55  ;;  %v375_v59 = vld [vmem:[#allocation7 + $0x30] sm:$0xff] }
 0x122   :  { %968 = vmatprep.subr.mxu0 %v544_v60  ;;  %1030 = vmatprep.mubr.f32.mxu0 %v2826_v55  ;;  %v746_v60 = vld [vmem:[#allocation7 + $0xbc8] sm:$0xff] }
 0x123   :  { %898 = vmatpush1.msra.mxu1 %v541_v61  ;;  %969 = vmatpush1.msra.mxu0 %v543_v62  ;;  %v748_v61 = vld [vmem:[#allocation7 + $0xbd8] sm:$0xff]  ;;  %v745_v62 = vld [vmem:[#allocation7 + $0xbc0] sm:$0xff] }
 0x124   :  { %899 = vmatprep.subr.mxu1 %v530_v63  ;;  %970 = vmatprep.subr.mxu0 %v532_v0  ;;  %v747_v63 = vld [vmem:[#allocation7 + $0xbd0] sm:$0xff]  ;;  %v734_v0 = vld [vmem:[#allocation7 + $0xb68] sm:$0xff] }
 0x125   :  { %900 = vmatpush1.msra.mxu1 %v529_v1  ;;  %971 = vmatpush1.msra.mxu0 %v531_v2  ;;  %v736_v1 = vld [vmem:[#allocation7 + $0xb78] sm:$0xff]  ;;  %v733_v2 = vld [vmem:[#allocation7 + $0xb60] sm:$0xff] }
 0x126   :  { %901 = vmatprep.subr.mxu1 %v518_v3  ;;  %972 = vmatprep.subr.mxu0 %v520_v4  ;;  %v735_v3 = vld [vmem:[#allocation7 + $0xb70] sm:$0xff]  ;;  %v722_v4 = vld [vmem:[#allocation7 + $0xb08] sm:$0xff] }
 0x127   :  { %902 = vmatpush1.msra.mxu1 %v517_v5  ;;  %973 = vmatpush1.msra.mxu0 %v519_v6  ;;  %v724_v5 = vld [vmem:[#allocation7 + $0xb18] sm:$0xff]  ;;  %v721_v6 = vld [vmem:[#allocation7 + $0xb00] sm:$0xff] }
 0x128   :  { %903 = vmatprep.subr.mxu1 %v506_v7  ;;  %974 = vmatprep.subr.mxu0 %v508_v8  ;;  %v723_v7 = vld [vmem:[#allocation7 + $0xb10] sm:$0xff]  ;;  %v710_v8 = vld [vmem:[#allocation7 + $0xaa8] sm:$0xff] }
 0x129   :  { %904 = vmatpush1.msra.mxu1 %v505_v9  ;;  %975 = vmatpush1.msra.mxu0 %v507_v10  ;;  %v712_v9 = vld [vmem:[#allocation7 + $0xab8] sm:$0xff]  ;;  %v709_v10 = vld [vmem:[#allocation7 + $0xaa0] sm:$0xff] }
 0x12a   :  { %905 = vmatprep.subr.mxu1 %v494_v11  ;;  %976 = vmatprep.subr.mxu0 %v496_v12  ;;  %v711_v11 = vld [vmem:[#allocation7 + $0xab0] sm:$0xff]  ;;  %v698_v12 = vld [vmem:[#allocation7 + $0xa48] sm:$0xff] }
 0x12b   :  { %906 = vmatpush1.msra.mxu1 %v493_v13  ;;  %977 = vmatpush1.msra.mxu0 %v495_v14  ;;  %v700_v13 = vld [vmem:[#allocation7 + $0xa58] sm:$0xff]  ;;  %v697_v14 = vld [vmem:[#allocation7 + $0xa40] sm:$0xff] }
 0x12c   :  { %907 = vmatprep.subr.mxu1 %v482_v15  ;;  %978 = vmatprep.subr.mxu0 %v484_v16  ;;  %v699_v15 = vld [vmem:[#allocation7 + $0xa50] sm:$0xff]  ;;  %v686_v16 = vld [vmem:[#allocation7 + $0x9e8] sm:$0xff] }
 0x12d   :  { %908 = vmatpush1.msra.mxu1 %v481_v17  ;;  %979 = vmatpush1.msra.mxu0 %v483_v18  ;;  %v688_v17 = vld [vmem:[#allocation7 + $0x9f8] sm:$0xff]  ;;  %v685_v18 = vld [vmem:[#allocation7 + $0x9e0] sm:$0xff] }
 0x12e   :  { %909 = vmatprep.subr.mxu1 %v470_v19  ;;  %980 = vmatprep.subr.mxu0 %v472_v20  ;;  %v687_v19 = vld [vmem:[#allocation7 + $0x9f0] sm:$0xff]  ;;  %v674_v20 = vld [vmem:[#allocation7 + $0x988] sm:$0xff] }
 0x12f   :  { %910 = vmatpush1.msra.mxu1 %v469_v21  ;;  %981 = vmatpush1.msra.mxu0 %v471_v22  ;;  %v676_v21 = vld [vmem:[#allocation7 + $0x998] sm:$0xff]  ;;  %v673_v22 = vld [vmem:[#allocation7 + $0x980] sm:$0xff] }
 0x130   :  { %911 = vmatprep.subr.mxu1 %v458_v23  ;;  %982 = vmatprep.subr.mxu0 %v460_v24  ;;  %v675_v23 = vld [vmem:[#allocation7 + $0x990] sm:$0xff]  ;;  %v662_v24 = vld [vmem:[#allocation7 + $0x928] sm:$0xff] }
 0x131   :  { %912 = vmatpush1.msra.mxu1 %v457_v25  ;;  %983 = vmatpush1.msra.mxu0 %v459_v26  ;;  %v664_v25 = vld [vmem:[#allocation7 + $0x938] sm:$0xff]  ;;  %v661_v26 = vld [vmem:[#allocation7 + $0x920] sm:$0xff] }
 0x132   :  { %913 = vmatprep.subr.mxu1 %v446_v27  ;;  %984 = vmatprep.subr.mxu0 %v448_v28  ;;  %v663_v27 = vld [vmem:[#allocation7 + $0x930] sm:$0xff]  ;;  %v650_v28 = vld [vmem:[#allocation7 + $0x8c8] sm:$0xff] }
 0x133   :  { %914 = vmatpush1.msra.mxu1 %v445_v29  ;;  %985 = vmatpush1.msra.mxu0 %v447_v30  ;;  %v652_v29 = vld [vmem:[#allocation7 + $0x8d8] sm:$0xff]  ;;  %v649_v30 = vld [vmem:[#allocation7 + $0x8c0] sm:$0xff] }
 0x134   :  { %915 = vmatprep.subr.mxu1 %v434_v31  ;;  %986 = vmatprep.subr.mxu0 %v436_v33  ;;  %v651_v31 = vld [vmem:[#allocation7 + $0x8d0] sm:$0xff]  ;;  %v638_v33 = vld [vmem:[#allocation7 + $0x868] sm:$0xff] }
 0x135   :  { %916 = vmatpush1.msra.mxu1 %v433_v34  ;;  %987 = vmatpush1.msra.mxu0 %v435_v35  ;;  %v640_v34 = vld [vmem:[#allocation7 + $0x878] sm:$0xff]  ;;  %v637_v35 = vld [vmem:[#allocation7 + $0x860] sm:$0xff] }
 0x136   :  { %917 = vmatprep.subr.mxu1 %v422_v37  ;;  %988 = vmatprep.subr.mxu0 %v424_v38  ;;  %v639_v37 = vld [vmem:[#allocation7 + $0x870] sm:$0xff]  ;;  %v626_v38 = vld [vmem:[#allocation7 + $0x808] sm:$0xff] }
 0x137   :  { %918 = vmatpush1.msra.mxu1 %v421_v40  ;;  %989 = vmatpush1.msra.mxu0 %v423_v41  ;;  %v628_v40 = vld [vmem:[#allocation7 + $0x818] sm:$0xff]  ;;  %v625_v41 = vld [vmem:[#allocation7 + $0x800] sm:$0xff] }
 0x138   :  { %919 = vmatprep.subr.mxu1 %v410_v42  ;;  %990 = vmatprep.subr.mxu0 %v412_v43  ;;  %v627_v42 = vld [vmem:[#allocation7 + $0x810] sm:$0xff]  ;;  %v614_v43 = vld [vmem:[#allocation7 + $0x7a8] sm:$0xff] }
 0x139   :  { %920 = vmatpush1.msra.mxu1 %v409_v44  ;;  %991 = vmatpush1.msra.mxu0 %v411_v45  ;;  %v616_v44 = vld [vmem:[#allocation7 + $0x7b8] sm:$0xff]  ;;  %v613_v45 = vld [vmem:[#allocation7 + $0x7a0] sm:$0xff] }
 0x13a   :  { %921 = vmatprep.subr.mxu1 %v398_v46  ;;  %992 = vmatprep.subr.mxu0 %v400_v47  ;;  %v615_v46 = vld [vmem:[#allocation7 + $0x7b0] sm:$0xff]  ;;  %v602_v47 = vld [vmem:[#allocation7 + $0x748] sm:$0xff] }
 0x13b   :  { %922 = vmatpush1.msra.mxu1 %v397_v48  ;;  %993 = vmatpush1.msra.mxu0 %v399_v49  ;;  %v604_v48 = vld [vmem:[#allocation7 + $0x758] sm:$0xff]  ;;  %v601_v49 = vld [vmem:[#allocation7 + $0x740] sm:$0xff] }
 0x13c   :  { %923 = vmatprep.subr.mxu1 %v386_v50  ;;  %994 = vmatprep.subr.mxu0 %v388_v51  ;;  %v603_v50 = vld [vmem:[#allocation7 + $0x750] sm:$0xff]  ;;  %v590_v51 = vld [vmem:[#allocation7 + $0x6e8] sm:$0xff] }
 0x13d   :  { %924 = vmatpush1.msra.mxu1 %v385_v52  ;;  %995 = vmatpush1.msra.mxu0 %v387_v53  ;;  %v592_v52 = vld [vmem:[#allocation7 + $0x6f8] sm:$0xff]  ;;  %v589_v53 = vld [vmem:[#allocation7 + $0x6e0] sm:$0xff] }
 0x13e   :  { %925 = vmatprep.subr.mxu1 %v374_v54  ;;  %996 = vmatprep.subr.mxu0 %v376_v57  ;;  %v591_v54 = vld [vmem:[#allocation7 + $0x6f0] sm:$0xff]  ;;  %v578_v57 = vld [vmem:[#allocation7 + $0x688] sm:$0xff] }
 0x13f   :  { %926 = vmatpush1.msra.mxu1 %v373_v58  ;;  %997 = vmatpush1.msra.mxu0 %v375_v59  ;;  %v580_v58 = vld [vmem:[#allocation7 + $0x698] sm:$0xff]  ;;  %v577_v59 = vld [vmem:[#allocation7 + $0x680] sm:$0xff] }
 0x140   :  { %927 = vmatprep.subr.mxu1 %v746_v60  ;;  %998 = vmatprep.subr.mxu0 %v748_v61  ;;  %v579_v60 = vld [vmem:[#allocation7 + $0x690] sm:$0xff]  ;;  %v566_v61 = vld [vmem:[#allocation7 + $0x628] sm:$0xff] }
 0x141   :  { %928 = vmatpush2.msra.mxu1 %v745_v62  ;;  %999 = vmatpush2.msra.mxu0 %v747_v63  ;;  %v568_v62 = vld [vmem:[#allocation7 + $0x638] sm:$0xff]  ;;  %v565_v63 = vld [vmem:[#allocation7 + $0x620] sm:$0xff] }
 0x142   :  { %929 = vmatprep.subr.mxu1 %v734_v0  ;;  %1000 = vmatprep.subr.mxu0 %v736_v1  ;;  %v567_v0 = vld [vmem:[#allocation7 + $0x630] sm:$0xff]  ;;  %v558_v1 = vld [vmem:[#allocation7 + $0x5e8] sm:$0xff] }
 0x143   :  { %930 = vmatpush2.msra.mxu1 %v733_v2  ;;  %1001 = vmatpush2.msra.mxu0 %v735_v3  ;;  %v560_v2 = vld [vmem:[#allocation7 + $0x5f8] sm:$0xff]  ;;  %v557_v3 = vld [vmem:[#allocation7 + $0x5e0] sm:$0xff] }
 0x144   :  { %931 = vmatprep.subr.mxu1 %v722_v4  ;;  %1002 = vmatprep.subr.mxu0 %v724_v5  ;;  %v559_v4 = vld [vmem:[#allocation7 + $0x5f0] sm:$0xff]  ;;  %v546_v5 = vld [vmem:[#allocation7 + $0x588] sm:$0xff] }
 0x145   :  { %932 = vmatpush2.msra.mxu1 %v721_v6  ;;  %1003 = vmatpush2.msra.mxu0 %v723_v7  ;;  %v548_v6 = vld [vmem:[#allocation7 + $0x598] sm:$0xff]  ;;  %v545_v7 = vld [vmem:[#allocation7 + $0x580] sm:$0xff] }
 0x146   :  { %933 = vmatprep.subr.mxu1 %v710_v8  ;;  %1004 = vmatprep.subr.mxu0 %v712_v9  ;;  %v547_v8 = vld [vmem:[#allocation7 + $0x590] sm:$0xff]  ;;  %v534_v9 = vld [vmem:[#allocation7 + $0x528] sm:$0xff] }
 0x147   :  { %934 = vmatpush2.msra.mxu1 %v709_v10  ;;  %1005 = vmatpush2.msra.mxu0 %v711_v11  ;;  %v536_v10 = vld [vmem:[#allocation7 + $0x538] sm:$0xff]  ;;  %v533_v11 = vld [vmem:[#allocation7 + $0x520] sm:$0xff] }
 0x148   :  { %935 = vmatprep.subr.mxu1 %v698_v12  ;;  %1006 = vmatprep.subr.mxu0 %v700_v13  ;;  %v535_v12 = vld [vmem:[#allocation7 + $0x530] sm:$0xff]  ;;  %v522_v13 = vld [vmem:[#allocation7 + $0x4c8] sm:$0xff] }
 0x149   :  { %936 = vmatpush2.msra.mxu1 %v697_v14  ;;  %1007 = vmatpush2.msra.mxu0 %v699_v15  ;;  %v524_v14 = vld [vmem:[#allocation7 + $0x4d8] sm:$0xff]  ;;  %v521_v15 = vld [vmem:[#allocation7 + $0x4c0] sm:$0xff] }
 0x14a   :  { %937 = vmatprep.subr.mxu1 %v686_v16  ;;  %1008 = vmatprep.subr.mxu0 %v688_v17  ;;  %v523_v16 = vld [vmem:[#allocation7 + $0x4d0] sm:$0xff]  ;;  %v510_v17 = vld [vmem:[#allocation7 + $0x468] sm:$0xff] }
 0x14b   :  { %938 = vmatpush2.msra.mxu1 %v685_v18  ;;  %1009 = vmatpush2.msra.mxu0 %v687_v19  ;;  %v512_v18 = vld [vmem:[#allocation7 + $0x478] sm:$0xff]  ;;  %v511_v19 = vld [vmem:[#allocation7 + $0x470] sm:$0xff] }
 0x14c   :  { %939 = vmatprep.subr.mxu1 %v674_v20  ;;  %1010 = vmatprep.subr.mxu0 %v676_v21  ;;  %v498_v20 = vld [vmem:[#allocation7 + $0x408] sm:$0xff]  ;;  %v500_v21 = vld [vmem:[#allocation7 + $0x418] sm:$0xff] }
 0x14d   :  { %940 = vmatpush2.msra.mxu1 %v673_v22  ;;  %1011 = vmatpush2.msra.mxu0 %v675_v23  ;;  %v497_v22 = vld [vmem:[#allocation7 + $0x400] sm:$0xff]  ;;  %v499_v23 = vld [vmem:[#allocation7 + $0x410] sm:$0xff] }
 0x14e   :  { %941 = vmatprep.subr.mxu1 %v662_v24  ;;  %1012 = vmatprep.subr.mxu0 %v664_v25  ;;  %v486_v24 = vld [vmem:[#allocation7 + $0x3a8] sm:$0xff]  ;;  %v488_v25 = vld [vmem:[#allocation7 + $0x3b8] sm:$0xff] }
 0x14f   :  { %942 = vmatpush2.msra.mxu1 %v661_v26  ;;  %1013 = vmatpush2.msra.mxu0 %v663_v27  ;;  %v485_v26 = vld [vmem:[#allocation7 + $0x3a0] sm:$0xff]  ;;  %v487_v27 = vld [vmem:[#allocation7 + $0x3b0] sm:$0xff] }
 0x150   :  { %943 = vmatprep.subr.mxu1 %v650_v28  ;;  %1014 = vmatprep.subr.mxu0 %v652_v29  ;;  %v474_v28 = vld [vmem:[#allocation7 + $0x348] sm:$0xff]  ;;  %v476_v29 = vld [vmem:[#allocation7 + $0x358] sm:$0xff] }
 0x151   :  { %944 = vmatpush2.msra.mxu1 %v649_v30  ;;  %1015 = vmatpush2.msra.mxu0 %v651_v31  ;;  %v473_v30 = vld [vmem:[#allocation7 + $0x340] sm:$0xff]  ;;  %v475_v31 = vld [vmem:[#allocation7 + $0x350] sm:$0xff] }
 0x152   :  { %945 = vmatprep.subr.mxu1 %v638_v33  ;;  %1016 = vmatprep.subr.mxu0 %v640_v34  ;;  %v462_v33 = vld [vmem:[#allocation7 + $0x2e8] sm:$0xff]  ;;  %v464_v34 = vld [vmem:[#allocation7 + $0x2f8] sm:$0xff] }
 0x153   :  { %946 = vmatpush2.msra.mxu1 %v637_v35  ;;  %1017 = vmatpush2.msra.mxu0 %v639_v37  ;;  %v461_v35 = vld [vmem:[#allocation7 + $0x2e0] sm:$0xff]  ;;  %v463_v37 = vld [vmem:[#allocation7 + $0x2f0] sm:$0xff] }
 0x154   :  { %947 = vmatprep.subr.mxu1 %v626_v38  ;;  %1018 = vmatprep.subr.mxu0 %v628_v40  ;;  %v450_v38 = vld [vmem:[#allocation7 + $0x288] sm:$0xff]  ;;  %v452_v40 = vld [vmem:[#allocation7 + $0x298] sm:$0xff] }
 0x155   :  { %948 = vmatpush2.msra.mxu1 %v625_v41  ;;  %1019 = vmatpush2.msra.mxu0 %v627_v42  ;;  %v449_v41 = vld [vmem:[#allocation7 + $0x280] sm:$0xff]  ;;  %v451_v42 = vld [vmem:[#allocation7 + $0x290] sm:$0xff] }
 0x156   :  { %949 = vmatprep.subr.mxu1 %v614_v43  ;;  %1020 = vmatprep.subr.mxu0 %v616_v44  ;;  %v438_v43 = vld [vmem:[#allocation7 + $0x228] sm:$0xff]  ;;  %v440_v44 = vld [vmem:[#allocation7 + $0x238] sm:$0xff] }
 0x157   :  { %950 = vmatpush2.msra.mxu1 %v613_v45  ;;  %1021 = vmatpush2.msra.mxu0 %v615_v46  ;;  %v437_v45 = vld [vmem:[#allocation7 + $0x220] sm:$0xff]  ;;  %v439_v46 = vld [vmem:[#allocation7 + $0x230] sm:$0xff] }
 0x158   :  { %951 = vmatprep.subr.mxu1 %v602_v47  ;;  %1022 = vmatprep.subr.mxu0 %v604_v48  ;;  %v426_v47 = vld [vmem:[#allocation7 + $0x1c8] sm:$0xff]  ;;  %v428_v48 = vld [vmem:[#allocation7 + $0x1d8] sm:$0xff] }
 0x159   :  { %952 = vmatpush2.msra.mxu1 %v601_v49  ;;  %1023 = vmatpush2.msra.mxu0 %v603_v50  ;;  %v425_v49 = vld [vmem:[#allocation7 + $0x1c0] sm:$0xff]  ;;  %v427_v50 = vld [vmem:[#allocation7 + $0x1d0] sm:$0xff] }
 0x15a   :  { %953 = vmatprep.subr.mxu1 %v590_v51  ;;  %1024 = vmatprep.subr.mxu0 %v592_v52  ;;  %v414_v51 = vld [vmem:[#allocation7 + $0x168] sm:$0xff]  ;;  %v416_v52 = vld [vmem:[#allocation7 + $0x178] sm:$0xff] }
 0x15b   :  { %954 = vmatpush2.msra.mxu1 %v589_v53  ;;  %1025 = vmatpush2.msra.mxu0 %v591_v54  ;;  %v413_v53 = vld [vmem:[#allocation7 + $0x160] sm:$0xff]  ;;  %v415_v54 = vld [vmem:[#allocation7 + $0x170] sm:$0xff] }
 0x15c   :  { %955 = vmatprep.subr.mxu1 %v578_v57  ;;  %1026 = vmatprep.subr.mxu0 %v580_v58  ;;  %v402_v57 = vld [vmem:[#allocation7 + $0x108] sm:$0xff]  ;;  %v404_v58 = vld [vmem:[#allocation7 + $0x118] sm:$0xff] }
 0x15d   :  { %956 = vmatpush2.msra.mxu1 %v577_v59  ;;  %1027 = vmatpush2.msra.mxu0 %v579_v60  ;;  %v401_v59 = vld [vmem:[#allocation7 + $0x100] sm:$0xff]  ;;  %v403_v60 = vld [vmem:[#allocation7 + $0x110] sm:$0xff] }
 0x15e   :  { %957 = vmatprep.subr.mxu1 %v566_v61  ;;  %1028 = vmatprep.subr.mxu0 %v568_v62  ;;  %v390_v61 = vld [vmem:[#allocation7 + $0xa8] sm:$0xff]  ;;  %v392_v62 = vld [vmem:[#allocation7 + $0xb8] sm:$0xff] }
 0x15f   :  { %958 = vmatpush2.msra.mxu1 %v565_v63  ;;  %1029 = vmatpush2.msra.mxu0 %v567_v0  ;;  %v389_v63 = vld [vmem:[#allocation7 + $0xa0] sm:$0xff]  ;;  %v391_v0 = vld [vmem:[#allocation7 + $0xb0] sm:$0xff] }
 0x160   :  { %960 = vmatmul.mubr.f32.vlgmr.msra.gmra.mxu1 %v2828_v56  ;;  %1031 = vmatmul.mubr.f32.vlgmr.msra.gmra.mxu0 %v2828_v56 }
 0x161   :  { %1037 = vmatprep.subr.mxu1 %v558_v1  ;;  %1108 = vmatprep.subr.mxu0 %v560_v2  ;;  %v378_v1 = vld [vmem:[#allocation7 + $0x48] sm:$0xff]  ;;  %v380_v2 = vld [vmem:[#allocation7 + $0x58] sm:$0xff] }
 0x162   :  { %1038 = vmatpush1.msra.mxu1 %v557_v3  ;;  %1101 = vmatprep.mubr.f32.mxu1 %v2826_v55  ;;  %v377_v3 = vld [vmem:[#allocation7 + $0x40] sm:$0xff] }
 0x163   :  { %1109 = vmatpush1.msra.mxu0 %v559_v4  ;;  %1172 = vmatprep.mubr.f32.mxu0 %v2826_v55  ;;  %v509_v55 = vld [vmem:[#allocation7 + $0x460] sm:$0xff]  ;;  %v379_v4 = vld [vmem:[#allocation7 + $0x50] sm:$0xff] }
 0x164   :  { %1039 = vmatprep.subr.mxu1 %v546_v5  ;;  %1110 = vmatprep.subr.mxu0 %v548_v6  ;;  %v750_v5 = vld [vmem:[#allocation7 + $0xbe8] sm:$0xff]  ;;  %v752_v6 = vld [vmem:[#allocation7 + $0xbf8] sm:$0xff] }
 0x165   :  { %1040 = vmatpush1.msra.mxu1 %v545_v7  ;;  %1111 = vmatpush1.msra.mxu0 %v547_v8  ;;  %v749_v7 = vld [vmem:[#allocation7 + $0xbe0] sm:$0xff]  ;;  %v751_v8 = vld [vmem:[#allocation7 + $0xbf0] sm:$0xff] }
 0x166   :  { %1041 = vmatprep.subr.mxu1 %v534_v9  ;;  %1112 = vmatprep.subr.mxu0 %v536_v10  ;;  %v738_v9 = vld [vmem:[#allocation7 + $0xb88] sm:$0xff]  ;;  %v740_v10 = vld [vmem:[#allocation7 + $0xb98] sm:$0xff] }
 0x167   :  { %1042 = vmatpush1.msra.mxu1 %v533_v11  ;;  %1113 = vmatpush1.msra.mxu0 %v535_v12  ;;  %v737_v11 = vld [vmem:[#allocation7 + $0xb80] sm:$0xff]  ;;  %v739_v12 = vld [vmem:[#allocation7 + $0xb90] sm:$0xff] }
 0x168   :  { %1043 = vmatprep.subr.mxu1 %v522_v13  ;;  %1114 = vmatprep.subr.mxu0 %v524_v14  ;;  %v726_v13 = vld [vmem:[#allocation7 + $0xb28] sm:$0xff]  ;;  %v728_v14 = vld [vmem:[#allocation7 + $0xb38] sm:$0xff] }
 0x169   :  { %1044 = vmatpush1.msra.mxu1 %v521_v15  ;;  %1115 = vmatpush1.msra.mxu0 %v523_v16  ;;  %v725_v15 = vld [vmem:[#allocation7 + $0xb20] sm:$0xff]  ;;  %v727_v16 = vld [vmem:[#allocation7 + $0xb30] sm:$0xff] }
 0x16a   :  { %1045 = vmatprep.subr.mxu1 %v510_v17  ;;  %1116 = vmatprep.subr.mxu0 %v512_v18  ;;  %v714_v17 = vld [vmem:[#allocation7 + $0xac8] sm:$0xff]  ;;  %v716_v18 = vld [vmem:[#allocation7 + $0xad8] sm:$0xff] }
 0x16b   :  { %1046 = vmatpush1.msra.mxu1 %v509_v55  ;;  %1117 = vmatpush1.msra.mxu0 %v511_v19  ;;  %v713_v55 = vld [vmem:[#allocation7 + $0xac0] sm:$0xff]  ;;  %v715_v19 = vld [vmem:[#allocation7 + $0xad0] sm:$0xff] }
 0x16c   :  { %1047 = vmatprep.subr.mxu1 %v498_v20  ;;  %1118 = vmatprep.subr.mxu0 %v500_v21  ;;  %v702_v20 = vld [vmem:[#allocation7 + $0xa68] sm:$0xff]  ;;  %v704_v21 = vld [vmem:[#allocation7 + $0xa78] sm:$0xff] }
 0x16d   :  { %1048 = vmatpush1.msra.mxu1 %v497_v22  ;;  %1119 = vmatpush1.msra.mxu0 %v499_v23  ;;  %v701_v22 = vld [vmem:[#allocation7 + $0xa60] sm:$0xff]  ;;  %v703_v23 = vld [vmem:[#allocation7 + $0xa70] sm:$0xff] }
 0x16e   :  { %1049 = vmatprep.subr.mxu1 %v486_v24  ;;  %1120 = vmatprep.subr.mxu0 %v488_v25  ;;  %v690_v24 = vld [vmem:[#allocation7 + $0xa08] sm:$0xff]  ;;  %v692_v25 = vld [vmem:[#allocation7 + $0xa18] sm:$0xff] }
 0x16f   :  { %1050 = vmatpush1.msra.mxu1 %v485_v26  ;;  %1121 = vmatpush1.msra.mxu0 %v487_v27  ;;  %v689_v26 = vld [vmem:[#allocation7 + $0xa00] sm:$0xff]  ;;  %v691_v27 = vld [vmem:[#allocation7 + $0xa10] sm:$0xff] }
 0x170   :  { %1051 = vmatprep.subr.mxu1 %v474_v28  ;;  %1122 = vmatprep.subr.mxu0 %v476_v29  ;;  %v678_v28 = vld [vmem:[#allocation7 + $0x9a8] sm:$0xff]  ;;  %v680_v29 = vld [vmem:[#allocation7 + $0x9b8] sm:$0xff] }
 0x171   :  { %1052 = vmatpush1.msra.mxu1 %v473_v30  ;;  %1123 = vmatpush1.msra.mxu0 %v475_v31  ;;  %v677_v30 = vld [vmem:[#allocation7 + $0x9a0] sm:$0xff]  ;;  %v679_v31 = vld [vmem:[#allocation7 + $0x9b0] sm:$0xff] }
 0x172   :  { %1053 = vmatprep.subr.mxu1 %v462_v33  ;;  %1124 = vmatprep.subr.mxu0 %v464_v34  ;;  %v666_v33 = vld [vmem:[#allocation7 + $0x948] sm:$0xff]  ;;  %v668_v34 = vld [vmem:[#allocation7 + $0x958] sm:$0xff] }
 0x173   :  { %1054 = vmatpush1.msra.mxu1 %v461_v35  ;;  %1125 = vmatpush1.msra.mxu0 %v463_v37  ;;  %v665_v35 = vld [vmem:[#allocation7 + $0x940] sm:$0xff]  ;;  %v667_v37 = vld [vmem:[#allocation7 + $0x950] sm:$0xff] }
 0x174   :  { %1055 = vmatprep.subr.mxu1 %v450_v38  ;;  %1126 = vmatprep.subr.mxu0 %v452_v40  ;;  %v654_v38 = vld [vmem:[#allocation7 + $0x8e8] sm:$0xff]  ;;  %v656_v40 = vld [vmem:[#allocation7 + $0x8f8] sm:$0xff] }
 0x175   :  { %1056 = vmatpush1.msra.mxu1 %v449_v41  ;;  %1127 = vmatpush1.msra.mxu0 %v451_v42  ;;  %v653_v41 = vld [vmem:[#allocation7 + $0x8e0] sm:$0xff]  ;;  %v655_v42 = vld [vmem:[#allocation7 + $0x8f0] sm:$0xff] }
 0x176   :  { %1057 = vmatprep.subr.mxu1 %v438_v43  ;;  %1128 = vmatprep.subr.mxu0 %v440_v44  ;;  %v642_v43 = vld [vmem:[#allocation7 + $0x888] sm:$0xff]  ;;  %v644_v44 = vld [vmem:[#allocation7 + $0x898] sm:$0xff] }
 0x177   :  { %1058 = vmatpush1.msra.mxu1 %v437_v45  ;;  %1129 = vmatpush1.msra.mxu0 %v439_v46  ;;  %v641_v45 = vld [vmem:[#allocation7 + $0x880] sm:$0xff]  ;;  %v643_v46 = vld [vmem:[#allocation7 + $0x890] sm:$0xff] }
 0x178   :  { %1059 = vmatprep.subr.mxu1 %v426_v47  ;;  %1130 = vmatprep.subr.mxu0 %v428_v48  ;;  %v630_v47 = vld [vmem:[#allocation7 + $0x828] sm:$0xff]  ;;  %v632_v48 = vld [vmem:[#allocation7 + $0x838] sm:$0xff] }
 0x179   :  { %1060 = vmatpush1.msra.mxu1 %v425_v49  ;;  %1131 = vmatpush1.msra.mxu0 %v427_v50  ;;  %v629_v49 = vld [vmem:[#allocation7 + $0x820] sm:$0xff]  ;;  %v631_v50 = vld [vmem:[#allocation7 + $0x830] sm:$0xff] }
 0x17a   :  { %1061 = vmatprep.subr.mxu1 %v414_v51  ;;  %1132 = vmatprep.subr.mxu0 %v416_v52  ;;  %v618_v51 = vld [vmem:[#allocation7 + $0x7c8] sm:$0xff]  ;;  %v620_v52 = vld [vmem:[#allocation7 + $0x7d8] sm:$0xff] }
 0x17b   :  { %1062 = vmatpush1.msra.mxu1 %v413_v53  ;;  %1133 = vmatpush1.msra.mxu0 %v415_v54  ;;  %v617_v53 = vld [vmem:[#allocation7 + $0x7c0] sm:$0xff]  ;;  %v619_v54 = vld [vmem:[#allocation7 + $0x7d0] sm:$0xff] }
 0x17c   :  { %1063 = vmatprep.subr.mxu1 %v402_v57  ;;  %1134 = vmatprep.subr.mxu0 %v404_v58  ;;  %v606_v57 = vld [vmem:[#allocation7 + $0x768] sm:$0xff]  ;;  %v608_v58 = vld [vmem:[#allocation7 + $0x778] sm:$0xff] }
 0x17d   :  { %1064 = vmatpush1.msra.mxu1 %v401_v59  ;;  %1135 = vmatpush1.msra.mxu0 %v403_v60  ;;  %v605_v59 = vld [vmem:[#allocation7 + $0x760] sm:$0xff]  ;;  %v607_v60 = vld [vmem:[#allocation7 + $0x770] sm:$0xff] }
 0x17e   :  { %1065 = vmatprep.subr.mxu1 %v390_v61  ;;  %1136 = vmatprep.subr.mxu0 %v392_v62  ;;  %v594_v61 = vld [vmem:[#allocation7 + $0x708] sm:$0xff]  ;;  %v596_v62 = vld [vmem:[#allocation7 + $0x718] sm:$0xff] }
 0x17f   :  { %1066 = vmatpush1.msra.mxu1 %v389_v63  ;;  %1137 = vmatpush1.msra.mxu0 %v391_v0  ;;  %v593_v63 = vld [vmem:[#allocation7 + $0x700] sm:$0xff]  ;;  %v595_v0 = vld [vmem:[#allocation7 + $0x710] sm:$0xff] }
 0x180   :  { %1067 = vmatprep.subr.mxu1 %v378_v1  ;;  %1138 = vmatprep.subr.mxu0 %v380_v2  ;;  %v582_v1 = vld [vmem:[#allocation7 + $0x6a8] sm:$0xff]  ;;  %v584_v2 = vld [vmem:[#allocation7 + $0x6b8] sm:$0xff] }
 0x181   :  { %1068 = vmatpush1.msra.mxu1 %v377_v3  ;;  %1139 = vmatpush1.msra.mxu0 %v379_v4  ;;  %v581_v3 = vld [vmem:[#allocation7 + $0x6a0] sm:$0xff]  ;;  %v583_v4 = vld [vmem:[#allocation7 + $0x6b0] sm:$0xff] }
 0x182   :  { %1069 = vmatprep.subr.mxu1 %v750_v5  ;;  %1140 = vmatprep.subr.mxu0 %v752_v6  ;;  %v570_v5 = vld [vmem:[#allocation7 + $0x648] sm:$0xff]  ;;  %v572_v6 = vld [vmem:[#allocation7 + $0x658] sm:$0xff] }
 0x183   :  { %1070 = vmatpush2.msra.mxu1 %v749_v7  ;;  %1141 = vmatpush2.msra.mxu0 %v751_v8  ;;  %v569_v7 = vld [vmem:[#allocation7 + $0x640] sm:$0xff]  ;;  %v571_v8 = vld [vmem:[#allocation7 + $0x650] sm:$0xff] }
 0x184   :  { %1071 = vmatprep.subr.mxu1 %v738_v9  ;;  %1142 = vmatprep.subr.mxu0 %v740_v10  ;;  %v1288_v9 = vld [vmem:[%s3656_s5 + $0xf8] sm:$0xff] }
 0x185   :  { %1072 = vmatpush2.msra.mxu1 %v737_v11  ;;  %1143 = vmatpush2.msra.mxu0 %v739_v12  ;;  %v1320_v10 = vld [vmem:[%s3656_s5 + $0x1f8] sm:$0xff] }
 0x186   :  { %1073 = vmatprep.subr.mxu1 %v726_v13  ;;  %1144 = vmatprep.subr.mxu0 %v728_v14  ;;  %v1272_v11 = vld [vmem:[%s3656_s5 + $0x78] sm:$0xff]  ;;  %v1319_v13 = vld [vmem:[%s3656_s5 + $0x1f0] sm:$0xff] }
 0x187   :  { %1074 = vmatpush2.msra.mxu1 %v725_v15  ;;  %1145 = vmatpush2.msra.mxu0 %v727_v16  ;;  %v1304_v12 = vld [vmem:[%s3656_s5 + $0x178] sm:$0xff]  ;;  %v1271_v14 = vld [vmem:[%s3656_s5 + $0x70] sm:$0xff]  ;;  %v1286_v16 = vld [vmem:[%s3656_s5 + $0xe8] sm:$0xff] }
 0x188   :  { %1075 = vmatprep.subr.mxu1 %v714_v17  ;;  %1146 = vmatprep.subr.mxu0 %v716_v18  ;;  %v1303_v15 = vld [vmem:[%s3656_s5 + $0x170] sm:$0xff]  ;;  %v1318_v17 = vld [vmem:[%s3656_s5 + $0x1e8] sm:$0xff] }
 0x189   :  { %1076 = vmatpush2.msra.mxu1 %v713_v55  ;;  %1147 = vmatpush2.msra.mxu0 %v715_v19  ;;  %v1270_v18 = vld [vmem:[%s3656_s5 + $0x68] sm:$0xff]  ;;  %v1285_v19 = vld [vmem:[%s3656_s5 + $0xe0] sm:$0xff] }
 0x18a   :  { %1077 = vmatprep.subr.mxu1 %v702_v20  ;;  %1148 = vmatprep.subr.mxu0 %v704_v21  ;;  %v1302_v55 = vld [vmem:[%s3656_s5 + $0x168] sm:$0xff]  ;;  %v1317_v20 = vld [vmem:[%s3656_s5 + $0x1e0] sm:$0xff] }
 0x18b   :  { %1078 = vmatpush2.msra.mxu1 %v701_v22  ;;  %1149 = vmatpush2.msra.mxu0 %v703_v23  ;;  %v1269_v21 = vld [vmem:[%s3656_s5 + $0x60] sm:$0xff]  ;;  %v1284_v23 = vld [vmem:[%s3656_s5 + $0xd8] sm:$0xff] }
 0x18c   :  { %1079 = vmatprep.subr.mxu1 %v690_v24  ;;  %1150 = vmatprep.subr.mxu0 %v692_v25  ;;  %v1301_v22 = vld [vmem:[%s3656_s5 + $0x160] sm:$0xff]  ;;  %v1316_v24 = vld [vmem:[%s3656_s5 + $0x1d8] sm:$0xff] }
 0x18d   :  { %1080 = vmatpush2.msra.mxu1 %v689_v26  ;;  %1151 = vmatpush2.msra.mxu0 %v691_v27  ;;  %v1268_v25 = vld [vmem:[%s3656_s5 + $0x58] sm:$0xff]  ;;  %v1283_v27 = vld [vmem:[%s3656_s5 + $0xd0] sm:$0xff] }
 0x18e   :  { %1081 = vmatprep.subr.mxu1 %v678_v28  ;;  %1152 = vmatprep.subr.mxu0 %v680_v29  ;;  %v1300_v26 = vld [vmem:[%s3656_s5 + $0x158] sm:$0xff]  ;;  %v1315_v28 = vld [vmem:[%s3656_s5 + $0x1d0] sm:$0xff] }
 0x18f   :  { %1082 = vmatpush2.msra.mxu1 %v677_v30  ;;  %1153 = vmatpush2.msra.mxu0 %v679_v31  ;;  %v1267_v29 = vld [vmem:[%s3656_s5 + $0x50] sm:$0xff]  ;;  %v1282_v31 = vld [vmem:[%s3656_s5 + $0xc8] sm:$0xff] }
 0x190   :  { %1083 = vmatprep.subr.mxu1 %v666_v33  ;;  %1154 = vmatprep.subr.mxu0 %v668_v34  ;;  %v1299_v30 = vld [vmem:[%s3656_s5 + $0x150] sm:$0xff]  ;;  %v1314_v33 = vld [vmem:[%s3656_s5 + $0x1c8] sm:$0xff] }
 0x191   :  { %1084 = vmatpush2.msra.mxu1 %v665_v35  ;;  %1155 = vmatpush2.msra.mxu0 %v667_v37  ;;  %v1266_v34 = vld [vmem:[%s3656_s5 + $0x48] sm:$0xff]  ;;  %v1281_v37 = vld [vmem:[%s3656_s5 + $0xc0] sm:$0xff] }
 0x192   :  { %1085 = vmatprep.subr.mxu1 %v654_v38  ;;  %1156 = vmatprep.subr.mxu0 %v656_v40  ;;  %v1298_v35 = vld [vmem:[%s3656_s5 + $0x148] sm:$0xff]  ;;  %v1313_v38 = vld [vmem:[%s3656_s5 + $0x1c0] sm:$0xff] }
 0x193   :  { %1086 = vmatpush2.msra.mxu1 %v653_v41  ;;  %1157 = vmatpush2.msra.mxu0 %v655_v42  ;;  %v1265_v40 = vld [vmem:[%s3656_s5 + $0x40] sm:$0xff]  ;;  %v1280_v42 = vld [vmem:[%s3656_s5 + $0xb8] sm:$0xff] }
 0x194   :  { %1087 = vmatprep.subr.mxu1 %v642_v43  ;;  %1158 = vmatprep.subr.mxu0 %v644_v44  ;;  %v1297_v41 = vld [vmem:[%s3656_s5 + $0x140] sm:$0xff]  ;;  %v1312_v43 = vld [vmem:[%s3656_s5 + $0x1b8] sm:$0xff] }
 0x195   :  { %1088 = vmatpush2.msra.mxu1 %v641_v45  ;;  %1159 = vmatpush2.msra.mxu0 %v643_v46  ;;  %v1264_v44 = vld [vmem:[%s3656_s5 + $0x38] sm:$0xff]  ;;  %v1279_v46 = vld [vmem:[%s3656_s5 + $0xb0] sm:$0xff] }
 0x196   :  { %1089 = vmatprep.subr.mxu1 %v630_v47  ;;  %1160 = vmatprep.subr.mxu0 %v632_v48  ;;  %v1296_v45 = vld [vmem:[%s3656_s5 + $0x138] sm:$0xff]  ;;  %v1311_v47 = vld [vmem:[%s3656_s5 + $0x1b0] sm:$0xff] }
 0x197   :  { %1090 = vmatpush2.msra.mxu1 %v629_v49  ;;  %1161 = vmatpush2.msra.mxu0 %v631_v50  ;;  %v1263_v48 = vld [vmem:[%s3656_s5 + $0x30] sm:$0xff]  ;;  %v1278_v50 = vld [vmem:[%s3656_s5 + $0xa8] sm:$0xff] }
 0x198   :  { %1091 = vmatprep.subr.mxu1 %v618_v51  ;;  %1162 = vmatprep.subr.mxu0 %v620_v52  ;;  %v1295_v49 = vld [vmem:[%s3656_s5 + $0x130] sm:$0xff]  ;;  %v1310_v51 = vld [vmem:[%s3656_s5 + $0x1a8] sm:$0xff] }
 0x199   :  { %1092 = vmatpush2.msra.mxu1 %v617_v53  ;;  %1163 = vmatpush2.msra.mxu0 %v619_v54  ;;  %v1262_v52 = vld [vmem:[%s3656_s5 + $0x28] sm:$0xff]  ;;  %v1277_v54 = vld [vmem:[%s3656_s5 + $0xa0] sm:$0xff] }
 0x19a   :  { %1093 = vmatprep.subr.mxu1 %v606_v57  ;;  %1164 = vmatprep.subr.mxu0 %v608_v58  ;;  %v1294_v53 = vld [vmem:[%s3656_s5 + $0x128] sm:$0xff]  ;;  %v1309_v57 = vld [vmem:[%s3656_s5 + $0x1a0] sm:$0xff] }
 0x19b   :  { %1094 = vmatpush2.msra.mxu1 %v605_v59  ;;  %1165 = vmatpush2.msra.mxu0 %v607_v60  ;;  %v1261_v58 = vld [vmem:[%s3656_s5 + $0x20] sm:$0xff]  ;;  %v1276_v60 = vld [vmem:[%s3656_s5 + $0x98] sm:$0xff] }
 0x19c   :  { %1095 = vmatprep.subr.mxu1 %v594_v61  ;;  %1166 = vmatprep.subr.mxu0 %v596_v62  ;;  %v1293_v59 = vld [vmem:[%s3656_s5 + $0x120] sm:$0xff]  ;;  %v1308_v61 = vld [vmem:[%s3656_s5 + $0x198] sm:$0xff] }
 0x19d   :  { %1096 = vmatpush2.msra.mxu1 %v593_v63  ;;  %1167 = vmatpush2.msra.mxu0 %v595_v0  ;;  %v1260_v62 = vld [vmem:[%s3656_s5 + $0x18] sm:$0xff]  ;;  %v1275_v0 = vld [vmem:[%s3656_s5 + $0x90] sm:$0xff] }
 0x19e   :  { %1097 = vmatprep.subr.mxu1 %v582_v1  ;;  %1168 = vmatprep.subr.mxu0 %v584_v2  ;;  %v1292_v63 = vld [vmem:[%s3656_s5 + $0x118] sm:$0xff]  ;;  %v1307_v1 = vld [vmem:[%s3656_s5 + $0x190] sm:$0xff] }
 0x19f   :  { %1098 = vmatpush2.msra.mxu1 %v581_v3  ;;  %1169 = vmatpush2.msra.mxu0 %v583_v4  ;;  %v1259_v2 = vld [vmem:[%s3656_s5 + $0x10] sm:$0xff]  ;;  %v1274_v4 = vld [vmem:[%s3656_s5 + $0x88] sm:$0xff] }
 0x1a0   :  { %1099 = vmatprep.subr.mxu1 %v570_v5  ;;  %1170 = vmatprep.subr.mxu0 %v572_v6  ;;  %v1291_v3 = vld [vmem:[%s3656_s5 + $0x110] sm:$0xff]  ;;  %v1306_v5 = vld [vmem:[%s3656_s5 + $0x188] sm:$0xff] }
 0x1a1   :  { %1100 = vmatpush2.msra.mxu1 %v569_v7  ;;  %1171 = vmatpush2.msra.mxu0 %v571_v8  ;;  %v1258_v6 = vld [vmem:[%s3656_s5 + $0x8] sm:$0xff]  ;;  %v1273_v8 = vld [vmem:[%s3656_s5 + $0x80] sm:$0xff] }
 0x1a2   :  { %1102 = vmatmul.mubr.f32.vlgmr.msra.gmra.mxu1 %v2828_v56  ;;  %1173 = vmatmul.mubr.f32.vlgmr.msra.gmra.mxu0 %v2828_v56  ;;  %v1287_v56 = vld [vmem:[%s3656_s5 + $0xf0] sm:$0xff]  ;;  %v1290_v7 = vld [vmem:[%s3656_s5 + $0x108] sm:$0xff] }
 0x1a3   :  { %2323 = vmatprep.subr.mxu1 %v1288_v9  ;;  %2358 = vmatprep.subr.mxu0 %v1320_v10  ;;  %v1305_v9 = vld [vmem:[%s3656_s5 + $0x180] sm:$0xff] }
 0x1a4   :  { %2324 = vmatpush3.msra.mxu1 %v1272_v11  ;;  %2359 = vmatpush3.msra.mxu0 %v1304_v12  ;;  %v1257_v10 = vld [vmem:[%s3656_s5] sm:$0xff]  ;;  %v2162_v12 = vld [vmem:[%s3656_s5 + $0x2f8] sm:$0xff] }
 0x1a5   :  { %2325 = vmatprep.subr.mxu1 %v1287_v56  ;;  %2360 = vmatprep.subr.mxu0 %v1319_v13  ;;  %v1289_v11 = vld [vmem:[%s3656_s5 + $0x100] sm:$0xff]  ;;  %v2194_v56 = vld [vmem:[%s3656_s5 + $0x3f8] sm:$0xff] }
 0x1a6   :  { %2326 = vmatpush3.msra.mxu1 %v1271_v14  ;;  %2361 = vmatpush3.msra.mxu0 %v1303_v15 }
 0x1a7   :  { %2327 = vmatprep.subr.mxu1 %v1286_v16  ;;  %2362 = vmatprep.subr.mxu0 %v1318_v17 }
 0x1a8   :  { %2328 = vmatpush3.msra.mxu1 %v1270_v18  ;;  %2363 = vmatpush3.msra.mxu0 %v1302_v55 }
 0x1a9   :  { %2329 = vmatprep.subr.mxu1 %v1285_v19  ;;  %2364 = vmatprep.subr.mxu0 %v1317_v20 }
 0x1aa   :  { %2330 = vmatpush3.msra.mxu1 %v1269_v21  ;;  %2365 = vmatpush3.msra.mxu0 %v1301_v22  ;;  %v1231_v22 = vsub.s32 2, %v2814_v32 }
 0x1ab   :  { %2331 = vmatprep.subr.mxu1 %v1284_v23  ;;  %2366 = vmatprep.subr.mxu0 %v1316_v24 }
 0x1ac   :  { %2332 = vmatpush3.msra.mxu1 %v1268_v25  ;;  %2367 = vmatpush3.msra.mxu0 %v1300_v26  ;;  %v1219_v25 = vld [vmem:[#allocation8] sm:$0xf]  ;;  %v1235_v26 = vsub.s32 3, %v2814_v32 }
 0x1ad   :  { %2333 = vmatprep.subr.mxu1 %v1283_v27  ;;  %2368 = vmatprep.subr.mxu0 %v1315_v28 }
 0x1ae   :  { %2334 = vmatpush3.msra.mxu1 %v1267_v29  ;;  %2369 = vmatpush3.msra.mxu0 %v1299_v30 }
 0x1af   :  { %2335 = vmatprep.subr.mxu1 %v1282_v31  ;;  %2370 = vmatprep.subr.mxu0 %v1314_v33 }
 0x1b0   :  { %2336 = vmatpush3.msra.mxu1 %v1266_v34  ;;  %2371 = vmatpush3.msra.mxu0 %v1298_v35  ;;  %v1224_v35 = vrot.slane %v1219_v25, %v357_v36 }
 0x1b1   :  { %2337 = vmatprep.subr.mxu1 %v1281_v37  ;;  %2372 = vmatprep.subr.mxu0 %v1313_v38  ;;  %v1232_v38 = vrot.slane %v1219_v25, %v1231_v22  ;;  %v2173_v22 = vld [vmem:[%s3656_s5 + $0x350] sm:$0xff] }
 0x1b2   :  { %2338 = vmatpush3.msra.mxu1 %v1265_v40  ;;  %2373 = vmatpush3.msra.mxu0 %v1297_v41 }
 0x1b3   :  { %2339 = vmatprep.subr.mxu1 %v1280_v42  ;;  %2374 = vmatprep.subr.mxu0 %v1312_v43  ;;  %v1228_v43 = vrot.slane %v1219_v25, %v361_v39 }
 0x1b4   :  { %2340 = vmatpush3.msra.mxu1 %v1264_v44  ;;  %2375 = vmatpush3.msra.mxu0 %v1296_v45  ;;  %v1236_v45 = vrot.slane %v1219_v25, %v1235_v26  ;;  %v2140_v25 = vld [vmem:[%s3656_s5 + $0x248] sm:$0xff] }
 0x1b5   :  { %2341 = vmatprep.subr.mxu1 %v1279_v46  ;;  %2376 = vmatprep.subr.mxu0 %v1311_v47  ;;  %v2172_v26 = vld [vmem:[%s3656_s5 + $0x348] sm:$0xff] }
 0x1b6   :  { %2342 = vmatpush3.msra.mxu1 %v1263_v48  ;;  %2377 = vmatpush3.msra.mxu0 %v1295_v49 }
 0x1b7   :  { %2343 = vmatprep.subr.mxu1 %v1278_v50  ;;  %2378 = vmatprep.subr.mxu0 %v1310_v51 }
 0x1b8   :  { %2344 = vmatpush3.msra.mxu1 %v1262_v52  ;;  %2379 = vmatpush3.msra.mxu0 %v1294_v53 }
 0x1b9   :  { %2345 = vmatprep.subr.mxu1 %v1277_v54  ;;  %2380 = vmatprep.subr.mxu0 %v1309_v57 }
 0x1ba   :  { %2346 = vmatpush3.msra.mxu1 %v1261_v58  ;;  %2381 = vmatpush3.msra.mxu0 %v1293_v59 }
 0x1bb   :  { %2347 = vmatprep.subr.mxu1 %v1276_v60  ;;  %2382 = vmatprep.subr.mxu0 %v1308_v61 }
 0x1bc   :  { %2348 = vmatpush3.msra.mxu1 %v1260_v62  ;;  %2383 = vmatpush3.msra.mxu0 %v1292_v63 }
 0x1bd   :  { %2349 = vmatprep.subr.mxu1 %v1275_v0  ;;  %2384 = vmatprep.subr.mxu0 %v1307_v1  ;;  %v2146_v1 = vld [vmem:[%s3656_s5 + $0x278] sm:$0xff] }
 0x1be   :  { %2350 = vmatpush3.msra.mxu1 %v1259_v2  ;;  %2385 = vmatpush3.msra.mxu0 %v1291_v3  ;;  %v2178_v2 = vld [vmem:[%s3656_s5 + $0x378] sm:$0xff]  ;;  %v2161_v3 = vld [vmem:[%s3656_s5 + $0x2f0] sm:$0xff] }
 0x1bf   :  { %2351 = vmatprep.subr.mxu1 %v1274_v4  ;;  %2386 = vmatprep.subr.mxu0 %v1306_v5 }
 0x1c0   :  { %2352 = vmatpush3.msra.mxu1 %v1258_v6  ;;  %2387 = vmatpush3.msra.mxu0 %v1290_v7  ;;  %v2193_v6 = vld [vmem:[%s3656_s5 + $0x3f0] sm:$0xff] }
 0x1c1   :  { %2353 = vmatprep.subr.mxu1 %v1273_v8  ;;  %2388 = vmatprep.subr.mxu0 %v1305_v9  ;;  %v2145_v7 = vld [vmem:[%s3656_s5 + $0x270] sm:$0xff]  ;;  %v2160_v9 = vld [vmem:[%s3656_s5 + $0x2e8] sm:$0xff] }
 0x1c2   :  { %2354 = vmatpush3.msra.mxu1 %v1257_v10  ;;  %2389 = vmatpush3.msra.mxu0 %v1289_v11  ;;  %v2177_v8 = vld [vmem:[%s3656_s5 + $0x370] sm:$0xff]  ;;  %v2192_v10 = vld [vmem:[%s3656_s5 + $0x3e8] sm:$0xff] }
 0x1c3   :  { %2393 = vmatprep.subr.mxu1 %v2162_v12  ;;  %2428 = vmatprep.subr.mxu0 %v2194_v56  ;;  %v2144_v11 = vld [vmem:[%s3656_s5 + $0x268] sm:$0xff]  ;;  %v2159_v56 = vld [vmem:[%s3656_s5 + $0x2e0] sm:$0xff] }
 0x1c4   :  { %v2176_v12 = vld [vmem:[%s3656_s5 + $0x368] sm:$0xff] }
 0x1df   :  { %v819_v13 = vpop.f32.mrf.mxu1  ;;  %v890_v14 = vpop.f32.mrf.mxu0 }
 0x1e0   :  { %v1183_v55 = vrot.slane %v819_v13, 6  ;;  %v1185_v19 = vrot.slane %v890_v14, 6  ;;  %v2191_v13 = vld [vmem:[%s3656_s5 + $0x3e0] sm:$0xff] }
 0x1e1   :  { %v821_v15 = vpop.f32.mrf.mxu1  ;;  %v892_v16 = vpop.f32.mrf.mxu0  ;;  %v2143_v14 = vld [vmem:[%s3656_s5 + $0x260] sm:$0xff] }
 0x1e2   :  { %v1184_v20 = vrot.slane %v821_v15, 6  ;;  %v1186_v21 = vrot.slane %v892_v16, 6  ;;  %v1191_v27 = vsel %vm337_vm1, 0.0, %v1183_v55  ;;  %v1193_v28 = vsel %vm337_vm1, 0.0, %v1185_v19  ;;  %v2175_v15 = vld [vmem:[%s3656_s5 + $0x360] sm:$0xff]  ;;  %v2158_v16 = vld [vmem:[%s3656_s5 + $0x2d8] sm:$0xff] }
 0x1e3   :  { %v2174_v55 = vld [vmem:[%s3656_s5 + $0x358] sm:$0xff]  ;;  %v2157_v19 = vld [vmem:[%s3656_s5 + $0x2d0] sm:$0xff] }
 0x1e4   :  { %v1192_v29 = vsel %vm337_vm1, 0.0, %v1184_v20  ;;  %v1194_v30 = vsel %vm337_vm1, 0.0, %v1186_v21  ;;  %v2189_v20 = vld [vmem:[%s3656_s5 + $0x3d0] sm:$0xff] }
 0x1e5   :  { %v2141_v21 = vld [vmem:[%s3656_s5 + $0x250] sm:$0xff] }
 0x220   :  { %v961_v17 = vpop.f32.mrf.mxu1  ;;  %v1032_v18 = vpop.f32.mrf.mxu0 }
 0x221   :  { %v1211_v40 = vadd.f32 %v1191_v27, %v961_v17  ;;  %v1213_v41 = vadd.f32 %v1193_v28, %v1032_v18  ;;  %v2190_v17 = vld [vmem:[%s3656_s5 + $0x3d8] sm:$0xff]  ;;  %v2155_v27 = vld [vmem:[%s3656_s5 + $0x2c0] sm:$0xff] }
 0x222   :  { %v963_v23 = vpop.f32.mrf.mxu1  ;;  %v1034_v24 = vpop.f32.mrf.mxu0  ;;  %v2142_v18 = vld [vmem:[%s3656_s5 + $0x258] sm:$0xff]  ;;  %v2187_v28 = vld [vmem:[%s3656_s5 + $0x3c0] sm:$0xff] }
 0x223   :  { %v1212_v50 = vadd.f32 %v1192_v29, %v963_v23  ;;  %v1214_v51 = vadd.f32 %v1194_v30, %v1034_v24  ;;  %v2156_v23 = vld [vmem:[%s3656_s5 + $0x2c8] sm:$0xff]  ;;  %v2139_v29 = vld [vmem:[%s3656_s5 + $0x240] sm:$0xff] }
 0x224   :  { %v2188_v24 = vld [vmem:[%s3656_s5 + $0x3c8] sm:$0xff]  ;;  %v2171_v30 = vld [vmem:[%s3656_s5 + $0x340] sm:$0xff] }
 0x262   :  { %v1103_v31 = vpop.f32.mrf.mxu1  ;;  %v1174_v33 = vpop.f32.mrf.mxu0 }
 0x263   :  { %v1199_v34 = vrot.slane %v1103_v31, 2  ;;  %v1201_v37 = vrot.slane %v1174_v33, 2  ;;  %v2154_v31 = vld [vmem:[%s3656_s5 + $0x2b8] sm:$0xff] }
 0x264   :  { %v1105_v42 = vpop.f32.mrf.mxu1  ;;  %v1176_v44 = vpop.f32.mrf.mxu0  ;;  %v2186_v33 = vld [vmem:[%s3656_s5 + $0x3b8] sm:$0xff] }
 0x265   :  { %v1207_v46 = vsel %vm346_vm2, %v1199_v34, 0.0  ;;  %v1209_v47 = vsel %vm346_vm2, %v1201_v37, 0.0  ;;  %v1200_v48 = vrot.slane %v1105_v42, 2  ;;  %v1202_v49 = vrot.slane %v1176_v44, 2  ;;  %v2138_v34 = vld [vmem:[%s3656_s5 + $0x238] sm:$0xff]  ;;  %v2153_v37 = vld [vmem:[%s3656_s5 + $0x2b0] sm:$0xff] }
 0x266   :  { %v1215_v52 = vadd.f32 %v1211_v40, %v1207_v46  ;;  %v1217_v36 = vadd.f32 %v1213_v41, %v1209_v47  ;;  %v2137_v40 = vld [vmem:[%s3656_s5 + $0x230] sm:$0xff]  ;;  %v2152_v42 = vld [vmem:[%s3656_s5 + $0x2a8] sm:$0xff]  ;;  %v2151_v46 = vld [vmem:[%s3656_s5 + $0x2a0] sm:$0xff] }
 0x267   :  { %v1208_v53 = vsel %vm346_vm2, %v1200_v48, 0.0  ;;  %v1210_v54 = vsel %vm346_vm2, %v1202_v49, 0.0  ;;  %v2169_v41 = vld [vmem:[%s3656_s5 + $0x330] sm:$0xff]  ;;  %v2136_v44 = vld [vmem:[%s3656_s5 + $0x228] sm:$0xff]  ;;  %v2183_v47 = vld [vmem:[%s3656_s5 + $0x3a0] sm:$0xff] }
 0x268   :  { %v1216_v57 = vadd.f32 %v1212_v50, %v1208_v53  ;;  %v1218_v58 = vadd.f32 %v1214_v51, %v1210_v54  ;;  %v1241_v32 = vadd.f32 %v1224_v35, %v1215_v52  ;;  %v1243_v39 = vadd.f32 %v1232_v38, %v1217_v36  ;;  %v2170_v35 = vld [vmem:[%s3656_s5 + $0x338] sm:$0xff]  ;;  %v2185_v38 = vld [vmem:[%s3656_s5 + $0x3b0] sm:$0xff]  ;;  %v2135_v48 = vld [vmem:[%s3656_s5 + $0x220] sm:$0xff] }
 0x269   :  { %v2167_v49 = vld [vmem:[%s3656_s5 + $0x320] sm:$0xff]  ;;  %v2150_v50 = vld [vmem:[%s3656_s5 + $0x298] sm:$0xff]  ;;  %v2149_v53 = vld [vmem:[%s3656_s5 + $0x290] sm:$0xff] }
 0x26a   :  { %v1242_v59 = vadd.f32 %v1228_v43, %v1216_v57  ;;  %v1244_v60 = vadd.f32 %v1236_v45, %v1218_v58  ;;  %v3058_v63 = vmax.f32 %v1241_v32, 0.0  ;;  %v3060_v0 = vmax.f32 %v1243_v39, 0.0  ;;  %v2184_v43 = vld [vmem:[%s3656_s5 + $0x3a8] sm:$0xff]  ;;  %v2182_v51 = vld [vmem:[%s3656_s5 + $0x398] sm:$0xff]  ;;  %v2181_v54 = vld [vmem:[%s3656_s5 + $0x390] sm:$0xff] }
 0x26b   :  { %v2168_v45 = vld [vmem:[%s3656_s5 + $0x328] sm:$0xff]  ;;  %v2134_v52 = vld [vmem:[%s3656_s5 + $0x218] sm:$0xff]  ;;  %v2133_v57 = vld [vmem:[%s3656_s5 + $0x210] sm:$0xff] }
 0x26c   :  { %v3054_v61 = vmax.f32 %v1242_v59, 0.0  ;;  %v3056_v62 = vmax.f32 %v1244_v60, 0.0  ;;  %v2166_v36 = vld [vmem:[%s3656_s5 + $0x318] sm:$0xff]  ;;  %v2165_v58 = vld [vmem:[%s3656_s5 + $0x310] sm:$0xff]  ;;  %v2148_v32 = vld [vmem:[%s3656_s5 + $0x288] sm:$0xff] }
 0x26d   :  { %v2180_v39 = vld [vmem:[%s3656_s5 + $0x388] sm:$0xff] }
 0x26e   :  { %1385 = vmatprep.mubr.f32.mxu1 %v3054_v61  ;;  %1455 = vmatprep.mubr.f32.mxu0 %v3056_v62  ;;  %v1532_v4 = vrot.slane %v3054_v61, 2  ;;  %v1534_v5 = vrot.slane %v3056_v62, 2  ;;  %v2132_v59 = vld [vmem:[%s3656_s5 + $0x208] sm:$0xff] }
 0x26f   :  { %1386 = vmatmul.mubr.f32.vlgmr.msra.gmra.mxu1 %v3058_v63  ;;  %1456 = vmatmul.mubr.f32.vlgmr.msra.gmra.mxu0 %v3060_v0  ;;  %v2164_v60 = vld [vmem:[%s3656_s5 + $0x308] sm:$0xff] }
 0x270   :  { %2394 = vmatpush3.msra.mxu1 %v2146_v1  ;;  %2429 = vmatpush3.msra.mxu0 %v2178_v2  ;;  %v2147_v1 = vld [vmem:[%s3656_s5 + $0x280] sm:$0xff] }
 0x271   :  { %2395 = vmatprep.subr.mxu1 %v2161_v3  ;;  %1603 = vmatprep.mubr.f32.mxu1 %v1532_v4  ;;  %v2179_v2 = vld [vmem:[%s3656_s5 + $0x380] sm:$0xff] }
 0x272   :  { %2430 = vmatprep.subr.mxu0 %v2193_v6  ;;  %1673 = vmatprep.mubr.f32.mxu0 %v1534_v5  ;;  %v2131_v3 = vld [vmem:[%s3656_s5 + $0x200] sm:$0xff]  ;;  %v1531_v5 = vrot.slane %v3058_v63, 2  ;;  %v1533_v6 = vrot.slane %v3060_v0, 2 }
 0x273   :  { %2396 = vmatpush3.msra.mxu1 %v2145_v7  ;;  %2431 = vmatpush3.msra.mxu0 %v2177_v8  ;;  %v2163_v4 = vld [vmem:[%s3656_s5 + $0x300] sm:$0xff]  ;;  %v2226_v7 = vld [vmem:[%s3656_s5 + $0x4f8] sm:$0xff] }
 0x274   :  { %2397 = vmatprep.subr.mxu1 %v2160_v9  ;;  %2432 = vmatprep.subr.mxu0 %v2192_v10  ;;  %v2258_v8 = vld [vmem:[%s3656_s5 + $0x5f8] sm:$0xff]  ;;  %v1746_v10 = vrot.slane %v3054_v61, 4 }
 0x275   :  { %2398 = vmatpush3.msra.mxu1 %v2144_v11  ;;  %2433 = vmatpush3.msra.mxu0 %v2176_v12  ;;  %v2210_v9 = vld [vmem:[%s3656_s5 + $0x478] sm:$0xff]  ;;  %v1748_v12 = vrot.slane %v3056_v62, 4 }
 0x276   :  { %2399 = vmatprep.subr.mxu1 %v2159_v56  ;;  %2434 = vmatprep.subr.mxu0 %v2191_v13  ;;  %v2242_v11 = vld [vmem:[%s3656_s5 + $0x578] sm:$0xff]  ;;  %v2225_v56 = vld [vmem:[%s3656_s5 + $0x4f0] sm:$0xff] }
 0x277   :  { %2400 = vmatpush3.msra.mxu1 %v2143_v14  ;;  %2435 = vmatpush3.msra.mxu0 %v2175_v15  ;;  %v2257_v13 = vld [vmem:[%s3656_s5 + $0x5f0] sm:$0xff] }
 0x278   :  { %2401 = vmatprep.subr.mxu1 %v2158_v16  ;;  %2436 = vmatprep.subr.mxu0 %v2190_v17  ;;  %v2209_v14 = vld [vmem:[%s3656_s5 + $0x470] sm:$0xff]  ;;  %v2224_v16 = vld [vmem:[%s3656_s5 + $0x4e8] sm:$0xff] }
 0x279   :  { %2402 = vmatpush3.msra.mxu1 %v2142_v18  ;;  %2437 = vmatpush3.msra.mxu0 %v2174_v55  ;;  %v2241_v15 = vld [vmem:[%s3656_s5 + $0x570] sm:$0xff]  ;;  %v2256_v17 = vld [vmem:[%s3656_s5 + $0x5e8] sm:$0xff] }
 0x27a   :  { %2403 = vmatprep.subr.mxu1 %v2157_v19  ;;  %2438 = vmatprep.subr.mxu0 %v2189_v20  ;;  %v2208_v18 = vld [vmem:[%s3656_s5 + $0x468] sm:$0xff]  ;;  %v2223_v19 = vld [vmem:[%s3656_s5 + $0x4e0] sm:$0xff] }
 0x27b   :  { %2404 = vmatpush3.msra.mxu1 %v2141_v21  ;;  %2439 = vmatpush3.msra.mxu0 %v2173_v22  ;;  %v2240_v55 = vld [vmem:[%s3656_s5 + $0x568] sm:$0xff]  ;;  %v2255_v20 = vld [vmem:[%s3656_s5 + $0x5e0] sm:$0xff] }
 0x27c   :  { %2405 = vmatprep.subr.mxu1 %v2156_v23  ;;  %2440 = vmatprep.subr.mxu0 %v2188_v24  ;;  %v2207_v21 = vld [vmem:[%s3656_s5 + $0x460] sm:$0xff]  ;;  %v2222_v23 = vld [vmem:[%s3656_s5 + $0x4d8] sm:$0xff] }
 0x27d   :  { %2406 = vmatpush3.msra.mxu1 %v2140_v25  ;;  %2441 = vmatpush3.msra.mxu0 %v2172_v26  ;;  %v2239_v22 = vld [vmem:[%s3656_s5 + $0x560] sm:$0xff]  ;;  %v2254_v24 = vld [vmem:[%s3656_s5 + $0x5d8] sm:$0xff] }
 0x27e   :  { %2407 = vmatprep.subr.mxu1 %v2155_v27  ;;  %2442 = vmatprep.subr.mxu0 %v2187_v28  ;;  %v2206_v25 = vld [vmem:[%s3656_s5 + $0x458] sm:$0xff]  ;;  %v2221_v27 = vld [vmem:[%s3656_s5 + $0x4d0] sm:$0xff] }
 0x27f   :  { %2408 = vmatpush3.msra.mxu1 %v2139_v29  ;;  %2443 = vmatpush3.msra.mxu0 %v2171_v30  ;;  %v2238_v26 = vld [vmem:[%s3656_s5 + $0x558] sm:$0xff]  ;;  %v2253_v28 = vld [vmem:[%s3656_s5 + $0x5d0] sm:$0xff] }
 0x280   :  { %2409 = vmatprep.subr.mxu1 %v2154_v31  ;;  %2444 = vmatprep.subr.mxu0 %v2186_v33  ;;  %v2205_v29 = vld [vmem:[%s3656_s5 + $0x450] sm:$0xff]  ;;  %v2220_v31 = vld [vmem:[%s3656_s5 + $0x4c8] sm:$0xff] }
 0x281   :  { %2410 = vmatpush3.msra.mxu1 %v2138_v34  ;;  %2445 = vmatpush3.msra.mxu0 %v2170_v35  ;;  %v2237_v30 = vld [vmem:[%s3656_s5 + $0x550] sm:$0xff]  ;;  %v2252_v33 = vld [vmem:[%s3656_s5 + $0x5c8] sm:$0xff] }
 0x282   :  { %2411 = vmatprep.subr.mxu1 %v2153_v37  ;;  %2446 = vmatprep.subr.mxu0 %v2185_v38  ;;  %v2204_v34 = vld [vmem:[%s3656_s5 + $0x448] sm:$0xff]  ;;  %v2219_v37 = vld [vmem:[%s3656_s5 + $0x4c0] sm:$0xff] }
 0x283   :  { %2412 = vmatpush3.msra.mxu1 %v2137_v40  ;;  %2447 = vmatpush3.msra.mxu0 %v2169_v41  ;;  %v2236_v35 = vld [vmem:[%s3656_s5 + $0x548] sm:$0xff]  ;;  %v2251_v38 = vld [vmem:[%s3656_s5 + $0x5c0] sm:$0xff] }
 0x284   :  { %2413 = vmatprep.subr.mxu1 %v2152_v42  ;;  %2448 = vmatprep.subr.mxu0 %v2184_v43  ;;  %v2203_v40 = vld [vmem:[%s3656_s5 + $0x440] sm:$0xff]  ;;  %v2218_v42 = vld [vmem:[%s3656_s5 + $0x4b8] sm:$0xff] }
 0x285   :  { %2414 = vmatpush3.msra.mxu1 %v2136_v44  ;;  %2449 = vmatpush3.msra.mxu0 %v2168_v45  ;;  %v2235_v41 = vld [vmem:[%s3656_s5 + $0x540] sm:$0xff]  ;;  %v2250_v43 = vld [vmem:[%s3656_s5 + $0x5b8] sm:$0xff] }
 0x286   :  { %2415 = vmatprep.subr.mxu1 %v2151_v46  ;;  %2450 = vmatprep.subr.mxu0 %v2183_v47  ;;  %v2202_v44 = vld [vmem:[%s3656_s5 + $0x438] sm:$0xff]  ;;  %v2217_v46 = vld [vmem:[%s3656_s5 + $0x4b0] sm:$0xff] }
 0x287   :  { %2416 = vmatpush3.msra.mxu1 %v2135_v48  ;;  %2451 = vmatpush3.msra.mxu0 %v2167_v49  ;;  %v2234_v45 = vld [vmem:[%s3656_s5 + $0x538] sm:$0xff]  ;;  %v2249_v47 = vld [vmem:[%s3656_s5 + $0x5b0] sm:$0xff] }
 0x288   :  { %2417 = vmatprep.subr.mxu1 %v2150_v50  ;;  %2452 = vmatprep.subr.mxu0 %v2182_v51  ;;  %v2201_v48 = vld [vmem:[%s3656_s5 + $0x430] sm:$0xff]  ;;  %v2216_v50 = vld [vmem:[%s3656_s5 + $0x4a8] sm:$0xff] }
 0x289   :  { %2418 = vmatpush3.msra.mxu1 %v2134_v52  ;;  %2453 = vmatpush3.msra.mxu0 %v2166_v36  ;;  %v2233_v49 = vld [vmem:[%s3656_s5 + $0x530] sm:$0xff]  ;;  %v2248_v51 = vld [vmem:[%s3656_s5 + $0x5a8] sm:$0xff] }
 0x28a   :  { %2419 = vmatprep.subr.mxu1 %v2149_v53  ;;  %2454 = vmatprep.subr.mxu0 %v2181_v54  ;;  %v2200_v52 = vld [vmem:[%s3656_s5 + $0x428] sm:$0xff]  ;;  %v2215_v53 = vld [vmem:[%s3656_s5 + $0x4a0] sm:$0xff] }
 0x28b   :  { %2420 = vmatpush3.msra.mxu1 %v2133_v57  ;;  %2455 = vmatpush3.msra.mxu0 %v2165_v58  ;;  %v2232_v36 = vld [vmem:[%s3656_s5 + $0x528] sm:$0xff]  ;;  %v2247_v54 = vld [vmem:[%s3656_s5 + $0x5a0] sm:$0xff] }
 0x28c   :  { %2421 = vmatprep.subr.mxu1 %v2148_v32  ;;  %2456 = vmatprep.subr.mxu0 %v2180_v39  ;;  %v2199_v57 = vld [vmem:[%s3656_s5 + $0x420] sm:$0xff]  ;;  %v2214_v32 = vld [vmem:[%s3656_s5 + $0x498] sm:$0xff] }
 0x28d   :  { %2422 = vmatpush3.msra.mxu1 %v2132_v59  ;;  %2457 = vmatpush3.msra.mxu0 %v2164_v60  ;;  %v2231_v58 = vld [vmem:[%s3656_s5 + $0x520] sm:$0xff]  ;;  %v2246_v39 = vld [vmem:[%s3656_s5 + $0x598] sm:$0xff] }
 0x28e   :  { %2423 = vmatprep.subr.mxu1 %v2147_v1  ;;  %2458 = vmatprep.subr.mxu0 %v2179_v2  ;;  %v2198_v59 = vld [vmem:[%s3656_s5 + $0x418] sm:$0xff]  ;;  %v2213_v1 = vld [vmem:[%s3656_s5 + $0x490] sm:$0xff] }
 0x28f   :  { %2424 = vmatpush3.msra.mxu1 %v2131_v3  ;;  %2459 = vmatpush3.msra.mxu0 %v2163_v4  ;;  %v2230_v60 = vld [vmem:[%s3656_s5 + $0x518] sm:$0xff]  ;;  %v2245_v2 = vld [vmem:[%s3656_s5 + $0x590] sm:$0xff] }
 0x290   :  { %1604 = vmatmul.mubr.f32.vlgmr.msra.gmra.mxu1 %v1531_v5  ;;  %1674 = vmatmul.mubr.f32.vlgmr.msra.gmra.mxu0 %v1533_v6  ;;  %v2197_v3 = vld [vmem:[%s3656_s5 + $0x410] sm:$0xff]  ;;  %v2212_v5 = vld [vmem:[%s3656_s5 + $0x488] sm:$0xff] }
 0x291   :  { %2463 = vmatprep.subr.mxu1 %v2226_v7  ;;  %2498 = vmatprep.subr.mxu0 %v2258_v8  ;;  %v2229_v4 = vld [vmem:[%s3656_s5 + $0x510] sm:$0xff]  ;;  %v2244_v6 = vld [vmem:[%s3656_s5 + $0x588] sm:$0xff] }
 0x292   :  { %2464 = vmatpush3.msra.mxu1 %v2210_v9  ;;  %1817 = vmatprep.mubr.f32.mxu1 %v1746_v10  ;;  %v2196_v7 = vld [vmem:[%s3656_s5 + $0x408] sm:$0xff]  ;;  %v2211_v9 = vld [vmem:[%s3656_s5 + $0x480] sm:$0xff] }
 0x293   :  { %2499 = vmatpush3.msra.mxu0 %v2242_v11  ;;  %1887 = vmatprep.mubr.f32.mxu0 %v1748_v12  ;;  %v2228_v8 = vld [vmem:[%s3656_s5 + $0x508] sm:$0xff]  ;;  %v2243_v10 = vld [vmem:[%s3656_s5 + $0x580] sm:$0xff] }
 0x294   :  { %2465 = vmatprep.subr.mxu1 %v2225_v56  ;;  %2500 = vmatprep.subr.mxu0 %v2257_v13  ;;  %v2195_v11 = vld [vmem:[%s3656_s5 + $0x400] sm:$0xff]  ;;  %v1745_v56 = vrot.slane %v3058_v63, 4  ;;  %v1747_v13 = vrot.slane %v3060_v0, 4 }
 0x295   :  { %2466 = vmatpush3.msra.mxu1 %v2209_v14  ;;  %2501 = vmatpush3.msra.mxu0 %v2241_v15  ;;  %v2227_v12 = vld [vmem:[%s3656_s5 + $0x500] sm:$0xff]  ;;  %v2290_v14 = vld [vmem:[%s3656_s5 + $0x6f8] sm:$0xff] }
 0x296   :  { %2467 = vmatprep.subr.mxu1 %v2224_v16  ;;  %2502 = vmatprep.subr.mxu0 %v2256_v17  ;;  %v2322_v15 = vld [vmem:[%s3656_s5 + $0x7f8] sm:$0xff]  ;;  %v1960_v17 = vrot.slane %v3054_v61, 6  ;;  %v2273_v61 = vld [vmem:[%s3656_s5 + $0x670] sm:$0xff] }
 0x297   :  { %2468 = vmatpush3.msra.mxu1 %v2208_v18  ;;  %2503 = vmatpush3.msra.mxu0 %v2240_v55  ;;  %v2274_v16 = vld [vmem:[%s3656_s5 + $0x678] sm:$0xff]  ;;  %v1962_v55 = vrot.slane %v3056_v62, 6  ;;  %v2288_v62 = vld [vmem:[%s3656_s5 + $0x6e8] sm:$0xff] }
 0x298   :  { %2469 = vmatprep.subr.mxu1 %v2223_v19  ;;  %2504 = vmatprep.subr.mxu0 %v2255_v20  ;;  %v2306_v18 = vld [vmem:[%s3656_s5 + $0x778] sm:$0xff]  ;;  %v2289_v19 = vld [vmem:[%s3656_s5 + $0x6f0] sm:$0xff] }
 0x299   :  { %2470 = vmatpush3.msra.mxu1 %v2207_v21  ;;  %2505 = vmatpush3.msra.mxu0 %v2239_v22  ;;  %v2321_v20 = vld [vmem:[%s3656_s5 + $0x7f0] sm:$0xff]  ;;  %v2320_v22 = vld [vmem:[%s3656_s5 + $0x7e8] sm:$0xff] }
 0x29a   :  { %2471 = vmatprep.subr.mxu1 %v2222_v23  ;;  %2506 = vmatprep.subr.mxu0 %v2254_v24  ;;  %v2305_v21 = vld [vmem:[%s3656_s5 + $0x770] sm:$0xff]  ;;  %v2272_v23 = vld [vmem:[%s3656_s5 + $0x668] sm:$0xff] }
 0x29b   :  { %2472 = vmatpush3.msra.mxu1 %v2206_v25  ;;  %2507 = vmatpush3.msra.mxu0 %v2238_v26  ;;  %v2304_v24 = vld [vmem:[%s3656_s5 + $0x768] sm:$0xff]  ;;  %v2287_v25 = vld [vmem:[%s3656_s5 + $0x6e0] sm:$0xff] }
 0x29c   :  { %2473 = vmatprep.subr.mxu1 %v2221_v27  ;;  %2508 = vmatprep.subr.mxu0 %v2253_v28  ;;  %v2319_v26 = vld [vmem:[%s3656_s5 + $0x7e0] sm:$0xff] }
 0x29d   :  { %2474 = vmatpush3.msra.mxu1 %v2205_v29  ;;  %2509 = vmatpush3.msra.mxu0 %v2237_v30  ;;  %v2271_v27 = vld [vmem:[%s3656_s5 + $0x660] sm:$0xff]  ;;  %v2286_v29 = vld [vmem:[%s3656_s5 + $0x6d8] sm:$0xff] }
 0x29e   :  { %2475 = vmatprep.subr.mxu1 %v2220_v31  ;;  %2510 = vmatprep.subr.mxu0 %v2252_v33  ;;  %v2303_v28 = vld [vmem:[%s3656_s5 + $0x760] sm:$0xff]  ;;  %v2318_v30 = vld [vmem:[%s3656_s5 + $0x7d8] sm:$0xff] }
 0x29f   :  { %2476 = vmatpush3.msra.mxu1 %v2204_v34  ;;  %2511 = vmatpush3.msra.mxu0 %v2236_v35  ;;  %v2270_v31 = vld [vmem:[%s3656_s5 + $0x658] sm:$0xff]  ;;  %v2285_v34 = vld [vmem:[%s3656_s5 + $0x6d0] sm:$0xff] }
 0x2a0   :  { %2477 = vmatprep.subr.mxu1 %v2219_v37  ;;  %2512 = vmatprep.subr.mxu0 %v2251_v38  ;;  %v2302_v33 = vld [vmem:[%s3656_s5 + $0x758] sm:$0xff]  ;;  %v2317_v35 = vld [vmem:[%s3656_s5 + $0x7d0] sm:$0xff] }
 0x2a1   :  { %2478 = vmatpush3.msra.mxu1 %v2203_v40  ;;  %2513 = vmatpush3.msra.mxu0 %v2235_v41  ;;  %v2269_v37 = vld [vmem:[%s3656_s5 + $0x650] sm:$0xff]  ;;  %v2284_v40 = vld [vmem:[%s3656_s5 + $0x6c8] sm:$0xff] }
 0x2a2   :  { %2479 = vmatprep.subr.mxu1 %v2218_v42  ;;  %2514 = vmatprep.subr.mxu0 %v2250_v43  ;;  %v2301_v38 = vld [vmem:[%s3656_s5 + $0x750] sm:$0xff]  ;;  %v2316_v41 = vld [vmem:[%s3656_s5 + $0x7c8] sm:$0xff] }
 0x2a3   :  { %2480 = vmatpush3.msra.mxu1 %v2202_v44  ;;  %2515 = vmatpush3.msra.mxu0 %v2234_v45  ;;  %v2268_v42 = vld [vmem:[%s3656_s5 + $0x648] sm:$0xff]  ;;  %v2283_v44 = vld [vmem:[%s3656_s5 + $0x6c0] sm:$0xff] }
 0x2a4   :  { %2481 = vmatprep.subr.mxu1 %v2217_v46  ;;  %2516 = vmatprep.subr.mxu0 %v2249_v47  ;;  %v2300_v43 = vld [vmem:[%s3656_s5 + $0x748] sm:$0xff]  ;;  %v2315_v45 = vld [vmem:[%s3656_s5 + $0x7c0] sm:$0xff] }
 0x2a5   :  { %2482 = vmatpush3.msra.mxu1 %v2201_v48  ;;  %2517 = vmatpush3.msra.mxu0 %v2233_v49  ;;  %v2267_v46 = vld [vmem:[%s3656_s5 + $0x640] sm:$0xff]  ;;  %v2282_v48 = vld [vmem:[%s3656_s5 + $0x6b8] sm:$0xff] }
 0x2a6   :  { %2483 = vmatprep.subr.mxu1 %v2216_v50  ;;  %2518 = vmatprep.subr.mxu0 %v2248_v51  ;;  %v2299_v47 = vld [vmem:[%s3656_s5 + $0x740] sm:$0xff]  ;;  %v2314_v49 = vld [vmem:[%s3656_s5 + $0x7b8] sm:$0xff] }
 0x2a7   :  { %2484 = vmatpush3.msra.mxu1 %v2200_v52  ;;  %2519 = vmatpush3.msra.mxu0 %v2232_v36  ;;  %v2266_v50 = vld [vmem:[%s3656_s5 + $0x638] sm:$0xff]  ;;  %v2281_v52 = vld [vmem:[%s3656_s5 + $0x6b0] sm:$0xff] }
 0x2a8   :  { %2485 = vmatprep.subr.mxu1 %v2215_v53  ;;  %2520 = vmatprep.subr.mxu0 %v2247_v54  ;;  %v2298_v51 = vld [vmem:[%s3656_s5 + $0x738] sm:$0xff]  ;;  %v2313_v36 = vld [vmem:[%s3656_s5 + $0x7b0] sm:$0xff] }
 0x2a9   :  { %2486 = vmatpush3.msra.mxu1 %v2199_v57  ;;  %2521 = vmatpush3.msra.mxu0 %v2231_v58  ;;  %v2265_v53 = vld [vmem:[%s3656_s5 + $0x630] sm:$0xff]  ;;  %v2280_v57 = vld [vmem:[%s3656_s5 + $0x6a8] sm:$0xff] }
 0x2aa   :  { %2487 = vmatprep.subr.mxu1 %v2214_v32  ;;  %2522 = vmatprep.subr.mxu0 %v2246_v39  ;;  %v2297_v54 = vld [vmem:[%s3656_s5 + $0x730] sm:$0xff]  ;;  %v2312_v58 = vld [vmem:[%s3656_s5 + $0x7a8] sm:$0xff] }
 0x2ab   :  { %2488 = vmatpush3.msra.mxu1 %v2198_v59  ;;  %2523 = vmatpush3.msra.mxu0 %v2230_v60  ;;  %v2264_v32 = vld [vmem:[%s3656_s5 + $0x628] sm:$0xff]  ;;  %v2279_v59 = vld [vmem:[%s3656_s5 + $0x6a0] sm:$0xff] }
 0x2ac   :  { %2489 = vmatprep.subr.mxu1 %v2213_v1  ;;  %2524 = vmatprep.subr.mxu0 %v2245_v2  ;;  %v2296_v39 = vld [vmem:[%s3656_s5 + $0x728] sm:$0xff]  ;;  %v2311_v60 = vld [vmem:[%s3656_s5 + $0x7a0] sm:$0xff] }
 0x2ad   :  { %2490 = vmatpush3.msra.mxu1 %v2197_v3  ;;  %2525 = vmatpush3.msra.mxu0 %v2229_v4  ;;  %v2263_v1 = vld [vmem:[%s3656_s5 + $0x620] sm:$0xff]  ;;  %v2278_v3 = vld [vmem:[%s3656_s5 + $0x698] sm:$0xff] }
 0x2ae   :  { %2491 = vmatprep.subr.mxu1 %v2212_v5  ;;  %2526 = vmatprep.subr.mxu0 %v2244_v6  ;;  %v2295_v2 = vld [vmem:[%s3656_s5 + $0x720] sm:$0xff]  ;;  %v2310_v4 = vld [vmem:[%s3656_s5 + $0x798] sm:$0xff] }
 0x2af   :  { %2492 = vmatpush3.msra.mxu1 %v2196_v7  ;;  %2527 = vmatpush3.msra.mxu0 %v2228_v8  ;;  %v2262_v5 = vld [vmem:[%s3656_s5 + $0x618] sm:$0xff]  ;;  %v2277_v7 = vld [vmem:[%s3656_s5 + $0x690] sm:$0xff] }
 0x2b0   :  { %2493 = vmatprep.subr.mxu1 %v2211_v9  ;;  %2528 = vmatprep.subr.mxu0 %v2243_v10  ;;  %v2294_v6 = vld [vmem:[%s3656_s5 + $0x718] sm:$0xff]  ;;  %v2309_v8 = vld [vmem:[%s3656_s5 + $0x790] sm:$0xff] }
 0x2b1   :  { %2494 = vmatpush3.msra.mxu1 %v2195_v11  ;;  %2529 = vmatpush3.msra.mxu0 %v2227_v12  ;;  %v2261_v9 = vld [vmem:[%s3656_s5 + $0x610] sm:$0xff]  ;;  %v2276_v11 = vld [vmem:[%s3656_s5 + $0x688] sm:$0xff] }
 0x2b2   :  { %1818 = vmatmul.mubr.f32.vlgmr.msra.gmra.mxu1 %v1745_v56  ;;  %1888 = vmatmul.mubr.f32.vlgmr.msra.gmra.mxu0 %v1747_v13  ;;  %v2293_v10 = vld [vmem:[%s3656_s5 + $0x710] sm:$0xff]  ;;  %v2308_v12 = vld [vmem:[%s3656_s5 + $0x788] sm:$0xff] }
 0x2b3   :  { %2533 = vmatprep.subr.mxu1 %v2290_v14  ;;  %2568 = vmatprep.subr.mxu0 %v2322_v15  ;;  %v2260_v56 = vld [vmem:[%s3656_s5 + $0x608] sm:$0xff]  ;;  %v2275_v14 = vld [vmem:[%s3656_s5 + $0x680] sm:$0xff] }
 0x2b4   :  { %2534 = vmatpush3.msra.mxu1 %v2274_v16  ;;  %2031 = vmatprep.mubr.f32.mxu1 %v1960_v17  ;;  %v2292_v13 = vld [vmem:[%s3656_s5 + $0x708] sm:$0xff]  ;;  %v2307_v15 = vld [vmem:[%s3656_s5 + $0x780] sm:$0xff] }
 0x2b5   :  { %2569 = vmatpush3.msra.mxu0 %v2306_v18  ;;  %2101 = vmatprep.mubr.f32.mxu0 %v1962_v55  ;;  %v2259_v16 = vld [vmem:[%s3656_s5 + $0x600] sm:$0xff]  ;;  %v1959_v18 = vrot.slane %v3058_v63, 6  ;;  %v1961_v55 = vrot.slane %v3060_v0, 6 }
 0x2b6   :  { %2535 = vmatprep.subr.mxu1 %v2289_v19  ;;  %2570 = vmatprep.subr.mxu0 %v2321_v20  ;;  %v2291_v17 = vld [vmem:[%s3656_s5 + $0x700] sm:$0xff]  ;;  %s2752_s5 = smov [#allocation11]  }
 0x2b7   :  { %2536 = vmatpush3.msra.mxu1 %v2273_v61  ;;  %2571 = vmatpush3.msra.mxu0 %v2305_v21  ;;  %s2116_s21 = sshll.u32 %s2752_s5, 4  ;;  %s2117_s21 = int_to_ptr.vmem [resolvable:$true] %s2116_s21 }
 0x2b8   :  { %2537 = vmatprep.subr.mxu1 %v2288_v62  ;;  %2572 = vmatprep.subr.mxu0 %v2320_v22  ;;  %s2714_s22 = scalar_lea.vmem %s2117_s21, 32  ;;  %p2719_p12 = scmp.lt.s32.totalorder %s2117_s21, %s2117_s21 }
 0x2b9   :  { %2538 = vmatpush3.msra.mxu1 %v2272_v23  ;;  %2573 = vmatpush3.msra.mxu0 %v2304_v24  ;;  %p2715_p11 = scmp.ne.s32.totalorder %s2117_s21, %s2714_s22  ;;  %p2720_p13 = scmp.lt.s32.totalorder %s2714_s22, %s2714_s22 }
 0x2ba   :  { %2539 = vmatprep.subr.mxu1 %v2287_v25  ;;  %2574 = vmatprep.subr.mxu0 %v2319_v26 }
 0x2bb   :  { %2540 = vmatpush3.msra.mxu1 %v2271_v27  ;;  %2575 = vmatpush3.msra.mxu0 %v2303_v28  ;;  %p2721_p0 = por %p2720_p13, %p2719_p12 }
 0x2bc   :  { %2541 = vmatprep.subr.mxu1 %v2286_v29  ;;  %2576 = vmatprep.subr.mxu0 %v2318_v30 }
 0x2bd   :  { %2542 = vmatpush3.msra.mxu1 %v2270_v31  ;;  %2577 = vmatpush3.msra.mxu0 %v2302_v33  ;;  %p2722_p1 = pnand %p2721_p0, %p2715_p11 }
 0x2be   :  { %2543 = vmatprep.subr.mxu1 %v2285_v34  ;;  %2578 = vmatprep.subr.mxu0 %v2317_v35  ;;  %v2130_v35 = vld [vmem:[#allocation10] ss:$0 sm:$0xff] }
 0x2bf   :  { %2544 = vmatpush3.msra.mxu1 %v2269_v37  ;;  %2579 = vmatpush3.msra.mxu0 %v2301_v38 }
 0x2c0   :  { %2545 = vmatprep.subr.mxu1 %v2284_v40  ;;  %2580 = vmatprep.subr.mxu0 %v2316_v41 }
 0x2c1   :  { %2546 = vmatpush3.msra.mxu1 %v2268_v42  ;;  %2581 = vmatpush3.msra.mxu0 %v2300_v43 }
 0x2c2   :  { %2547 = vmatprep.subr.mxu1 %v2283_v44  ;;  %2582 = vmatprep.subr.mxu0 %v2315_v45 }
 0x2c3   :  { %2548 = vmatpush3.msra.mxu1 %v2267_v46  ;;  %2583 = vmatpush3.msra.mxu0 %v2299_v47 }
 0x2c4   :  { %2549 = vmatprep.subr.mxu1 %v2282_v48  ;;  %2584 = vmatprep.subr.mxu0 %v2314_v49 }
 0x2c5   :  { %2550 = vmatpush3.msra.mxu1 %v2266_v50  ;;  %2585 = vmatpush3.msra.mxu0 %v2298_v51 }
 0x2c6   :  { %2551 = vmatprep.subr.mxu1 %v2281_v52  ;;  %2586 = vmatprep.subr.mxu0 %v2313_v36 }
 0x2c7   :  { %2552 = vmatpush3.msra.mxu1 %v2265_v53  ;;  %2587 = vmatpush3.msra.mxu0 %v2297_v54 }
 0x2c8   :  { %2553 = vmatprep.subr.mxu1 %v2280_v57  ;;  %2588 = vmatprep.subr.mxu0 %v2312_v58 }
 0x2c9   :  { %2554 = vmatpush3.msra.mxu1 %v2264_v32  ;;  %2589 = vmatpush3.msra.mxu0 %v2296_v39 }
 0x2ca   :  { %2555 = vmatprep.subr.mxu1 %v2279_v59  ;;  %2590 = vmatprep.subr.mxu0 %v2311_v60 }
 0x2cb   :  { %2556 = vmatpush3.msra.mxu1 %v2263_v1  ;;  %2591 = vmatpush3.msra.mxu0 %v2295_v2 }
 0x2cc   :  { %2557 = vmatprep.subr.mxu1 %v2278_v3  ;;  %2592 = vmatprep.subr.mxu0 %v2310_v4 }
 0x2cd   :  { %2558 = vmatpush3.msra.mxu1 %v2262_v5  ;;  %2593 = vmatpush3.msra.mxu0 %v2294_v6 }
 0x2ce   :  { %2559 = vmatprep.subr.mxu1 %v2277_v7  ;;  %2594 = vmatprep.subr.mxu0 %v2309_v8 }
 0x2cf   :  { %2560 = vmatpush3.msra.mxu1 %v2261_v9  ;;  %2595 = vmatpush3.msra.mxu0 %v2293_v10 }
 0x2d0   :  { %2561 = vmatprep.subr.mxu1 %v2276_v11  ;;  %2596 = vmatprep.subr.mxu0 %v2308_v12 }
 0x2d1   :  { %2562 = vmatpush3.msra.mxu1 %v2260_v56  ;;  %2597 = vmatpush3.msra.mxu0 %v2292_v13 }
 0x2d2   :  { %2563 = vmatprep.subr.mxu1 %v2275_v14  ;;  %2598 = vmatprep.subr.mxu0 %v2307_v15 }
 0x2d3   :  { %2564 = vmatpush3.msra.mxu1 %v2259_v16  ;;  %2599 = vmatpush3.msra.mxu0 %v2291_v17 }
 0x2d4   :  { %2032 = vmatmul.mubr.f32.vlgmr.msra.gmra.mxu1 %v1959_v18  ;;  %2102 = vmatmul.mubr.f32.vlgmr.msra.gmra.mxu0 %v1961_v55 }
 0x32f   :  { %v2355_v19 = vpop.f32.mrf.mxu1  ;;  %v2390_v20 = vpop.f32.mrf.mxu0 }
 0x331   :  { %v2356_v61 = vpop.f32.mrf.mxu1  ;;  %v2391_v21 = vpop.f32.mrf.mxu0 }
 0x332   :  { %v2357_v27 = vadd.f32 %v2356_v61, %v2355_v19  ;;  %v2392_v28 = vadd.f32 %v2391_v21, %v2390_v20 }
 0x334   :  { %v1458_v31 = vadd.f32 %v2392_v28, %v2357_v27 }
 0x336   :  { %v1461_v41 = vadd.f32 %v2130_v35, %v1458_v31 }
 0x350   :  { %v2425_v62 = vpop.f32.mrf.mxu1  ;;  %v2460_v22 = vpop.f32.mrf.mxu0 }
 0x352   :  { %v2426_v23 = vpop.f32.mrf.mxu1  ;;  %v2461_v24 = vpop.f32.mrf.mxu0 }
 0x353   :  { %v2427_v30 = vadd.f32 %v2426_v23, %v2425_v62  ;;  %v2462_v0 = vadd.f32 %v2461_v24, %v2460_v22 }
 0x355   :  { %v1676_v37 = vadd.f32 %v2462_v0, %v2427_v30 }
 0x357   :  { %v1679_v45 = vadd.f32 %v1676_v37, %v1461_v41 }
 0x372   :  { %v2495_v25 = vpop.f32.mrf.mxu1  ;;  %v2530_v26 = vpop.f32.mrf.mxu0 }
 0x374   :  { %v2496_v29 = vpop.f32.mrf.mxu1  ;;  %v2531_v63 = vpop.f32.mrf.mxu0 }
 0x375   :  { %v2497_v33 = vadd.f32 %v2496_v29, %v2495_v25  ;;  %v2532_v34 = vadd.f32 %v2531_v63, %v2530_v26 }
 0x377   :  { %v1890_v42 = vadd.f32 %v2532_v34, %v2497_v33 }
 0x379   :  { %v1893_v48 = vadd.f32 %v1890_v42, %v1679_v45 }
 0x394   :  { %v2565_v38 = vpop.f32.mrf.mxu1  ;;  %v2600_v40 = vpop.f32.mrf.mxu0 }
 0x396   :  { %v2566_v43 = vpop.f32.mrf.mxu1  ;;  %v2601_v44 = vpop.f32.mrf.mxu0 }
 0x397   :  { %v2567_v46 = vadd.f32 %v2566_v43, %v2565_v38  ;;  %v2602_v47 = vadd.f32 %v2601_v44, %v2600_v40 }
 0x399   :  { %v2104_v49 = vadd.f32 %v2602_v47, %v2567_v46 }
 0x39b   :  { %v2107_v50 = vadd.f32 %v2104_v49, %v1893_v48 }
 0x39d   :  { %2109 = vst.msk [vmem:[#allocation11] sm:$0x3] %vm2108_vm3, %v2107_v50 }
 0x39e   :  { %2725 = shalt.err (!%p2722_p1)
}
 0x39f   :  { %2119 = dma.vmem_to_hbm [thread:$0]  %s2117_s21, 32, %s3658_s7, [#allocation4]  }
 0x3a0   :  { %2740 = dma.done.wait [#allocation4], 32  }
 0x3a1   :  { %2741 = vsyncadd [#allocation4], 4294967264 }
 0x3a2   :  { %2123 = vsyncpa [#allocation3], 1 }
 0x3a3   :  { %2124 = vsyncpa [#allocation6], 1 }
 0x3a4   :  { %2125 = vsyncpa [#allocation9], 1 }
 0x3a5   :  { %2126 = vsyncpa [#allocation4], 1 }

</bundles_post_ra>
